<compile_context>
chip_gen: v7x
topology: tpu7x:2x2x1
jax: 0.10.0
libtpu: 0.0.40
codegen_flags: <defaults>
</compile_context>

<pallas_src>
import numpy as np

import jax
import jax.numpy as jnp
from jax import lax
from jax.experimental import pallas as pl
from jax.experimental.pallas import tpu as pltpu

# -----------------------------------------------------------------------------
# Static LeNet geometry
# -----------------------------------------------------------------------------
K = 5                      # conv kernel size
H0 = 32                    # input spatial size (Cin = 1)
OH1, OW1, C1 = 28, 28, 6   # conv1 output
PH1, PW1 = 14, 14          # pool1 output
OH2, OW2, C2 = 10, 10, 16  # conv2 output
PH2, PW2 = 5, 5            # pool2 output
F1, F2, F3 = 120, 84, 10   # fc sizes


# -----------------------------------------------------------------------------
# The single fused Pallas kernel (whole batch, no grid, no scratch)
# -----------------------------------------------------------------------------
def _lenet_kernel(x_ref, m1_ref, b1_ref, p1e_ref, s1e_ref,
                  m2_ref, b2_ref, p2e_ref, s2e_ref,
                  w1f_ref, bf1_ref, w2_ref, bf2_ref, w3_ref, bf3_ref,
                  o_ref):
    n = o_ref.shape[0]
    r1 = n * H0 - (K - 1)     # valid conv1 rows (image-major 32-row blocks)
    r2 = n * PH1 - (K - 1)    # valid conv2 rows (image-major 14-row blocks)

    def mm(a, b):
        return jnp.dot(a, b, preferred_element_type=jnp.float32)

    # ---- conv1 + bias + ReLU, batched over images ---------------------------
    # acc[i*32+oh, ow*6+co] = sum_kh x[i, 0, oh+kh, :] @ Toeplitz1[kh]
    x_all = x_ref[...]                                   # (n*32, 32)
    xs1 = [x_all[kh:kh + r1, :] for kh in range(K)]      # sublane shifts (XLU)
    acc = mm(xs1[0], m1_ref[0])
    for kh in range(1, K):
        acc = acc + mm(xs1[kh], m1_ref[kh])              # clean dot-acc chain
    a1 = jnp.maximum(acc + b1_ref[...], 0.0)             # (n*32-4, 168)

    # ---- 2x2 max-pool #1: shift+max (exact) + one selection matmul each -----
    rmax1 = jnp.maximum(a1[:r1 - 1, :], a1[1:r1, :])     # row-pair max
    pr1 = mm(p1e_ref[...], rmax1)                        # compact rows -> (n*14, 168)
    lmax1 = jnp.maximum(pr1[:, :OW1 * C1 - C1], pr1[:, C1:])   # lane-pair max (n*14, 162)
    p1 = mm(lmax1, s1e_ref[...])                         # compact lanes -> (n*14, 84)

    # ---- conv2 + bias + ReLU, batched over images ---------------------------
    xs2 = [p1[kh:kh + r2, :] for kh in range(K)]
    acc2 = mm(xs2[0], m2_ref[0])
    for kh in range(1, K):
        acc2 = acc2 + mm(xs2[kh], m2_ref[kh])
    a2 = jnp.maximum(acc2 + b2_ref[...], 0.0)            # (n*14-4, 160)

    # ---- 2x2 max-pool #2 (row compaction is h-major: output row = h*n + i) --
    rmax2 = jnp.maximum(a2[:r2 - 1, :], a2[1:r2, :])
    pr2 = mm(p2e_ref[...], rmax2)                        # (5n, 160)
    lmax2 = jnp.maximum(pr2[:, :OW2 * C2 - C2], pr2[:, C2:])   # (5n, 144)
    p2 = mm(lmax2, s2e_ref[...])                         # (5n, 80), row h*n+i

    # ---- flatten to an (n, 400) lane-dense matrix ---------------------------
    # flat[i, h*80 + w*16 + c] = pool2[i, c, h, w]; fc1's weight is repacked to
    # this ordering on the host, reproducing torch.flatten(x, 1) on NCHW.
    flat = jnp.concatenate([p2[h * n:(h + 1) * n, :] for h in range(PH2)],
                           axis=1)                       # (n, 400)

    # ---- fc1/fc2/fc3, batched over the whole mini-batch (M = n) -------------
    h1 = jnp.maximum(mm(flat, w1f_ref[...]) + bf1_ref[...], 0.0)   # (n, 120)
    h2 = jnp.maximum(mm(h1, w2_ref[...]) + bf2_ref[...], 0.0)      # (n, 84)
    o_ref[...] = mm(h2, w3_ref[...]) + bf3_ref[...]                # (n, 10), one store


# -----------------------------------------------------------------------------
# One-time host-side weight / selection-matrix packing (NOT on the hot path)
# -----------------------------------------------------------------------------
def prepare_params(p, batch):
    """Repack PyTorch-layout params + build batch-`batch` selection matrices."""

    def toeplitz(w_oihw, w_in):
        # M[kh][w*Cin + ci, ow*Cout + co] = w[co, ci, kh, w - ow]  (0 <= w-ow < K)
        cout, cin, khn, kwn = w_oihw.shape
        own = w_in - kwn + 1
        w = np.asarray(w_oihw, np.float32)
        m = np.zeros((khn, w_in * cin, own * cout), np.float32)
        for kh in range(khn):
            for ow in range(own):
                for kw in range(kwn):
                    wi = ow + kw
                    m[kh, wi * cin:(wi + 1) * cin, ow * cout:(ow + 1) * cout] = \
                        w[:, :, kh, kw].T
        return m

    def row_sel1(n):
        # picks row i*32 + 2*ph from the row-maxed conv1 output (image-major)
        m = np.zeros((n * PH1, n * H0 - K), np.float32)
        for i in range(n):
            for ph in range(PH1):
                m[i * PH1 + ph, i * H0 + 2 * ph] = 1.0
        return m

    def row_sel2(n):
        # picks row i*14 + 2*h, emitted h-major (row h*n + i) so the flatten
        # into (n, 400) is just contiguous slices.
        m = np.zeros((n * PH2, n * PH1 - K), np.float32)
        for h in range(PH2):
            for i in range(n):
                m[h * n + i, i * PH1 + 2 * h] = 1.0
        return m

    def lane_sel(ow, c):
        # picks lane (2*pw)*c + ci from the lane-maxed activation
        m = np.zeros((ow * c - c, (ow // 2) * c), np.float32)
        for pw in range(ow // 2):
            for ci in range(c):
                m[2 * pw * c + ci, pw * c + ci] = 1.0
        return m

    m1 = toeplitz(p["conv1_w"], H0)      # (5, 32, 168)
    m2 = toeplitz(p["conv2_w"], PH1)     # (5, 84, 160)
    b1 = np.tile(np.asarray(p["conv1_b"], np.float32), OW1)[None, :]   # (1, 168)
    b2 = np.tile(np.asarray(p["conv2_b"], np.float32), OW2)[None, :]   # (1, 160)

    # fc1_w[j, c*25 + h*5 + w]  ->  w1f[h*80 + w*16 + c, j]
    fc1 = np.asarray(p["fc1_w"], np.float32).reshape(F1, C2, PH2, PW2)
    w1f = np.transpose(fc1, (2, 3, 1, 0)).reshape(PH2 * PW2 * C2, F1)  # (400, 120)

    prep = dict(
        m1=m1, b1=b1, p1e=row_sel1(batch), s1e=lane_sel(OW1, C1),
        m2=m2, b2=b2, p2e=row_sel2(batch), s2e=lane_sel(OW2, C2),
        w1f=w1f,
        bf1=np.asarray(p["fc1_b"], np.float32)[None, :],
        w2=np.asarray(p["fc2_w"], np.float32).T,
        bf2=np.asarray(p["fc2_b"], np.float32)[None, :],
        w3=np.asarray(p["fc3_w"], np.float32).T,
        bf3=np.asarray(p["fc3_b"], np.float32)[None, :],
    )
    return {k: jnp.asarray(v) for k, v in prep.items()}


# -----------------------------------------------------------------------------
# Forward pass: one reshape + one pallas_call
# -----------------------------------------------------------------------------
@jax.jit
def net_forward(x_nchw, prep):
    n = x_nchw.shape[0]
    assert x_nchw.shape[1:] == (1, H0, H0), x_nchw.shape
    assert prep["p1e"].shape[0] == n * PH1, "prepare_params built for another batch"
    x2d = x_nchw.reshape(n * H0, H0)     # rows = n*32 + h, lanes = w (Cin = 1)

    args = (x2d,
            prep["m1"], prep["b1"], prep["p1e"], prep["s1e"],
            prep["m2"], prep["b2"], prep["p2e"], prep["s2e"],
            prep["w1f"], prep["bf1"], prep["w2"], prep["bf2"],
            prep["w3"], prep["bf3"])

    flops = 2 * n * (OH1 * OW1 * C1 * K * K * 1
                     + OH2 * OW2 * C2 * K * K * C1
                     + (C2 * PH2 * PW2) * F1 + F1 * F2 + F2 * F3)
    bytes_accessed = sum(int(np.prod(a.shape)) * 4 for a in args) + n * F3 * 4

    vmem = pl.BlockSpec(memory_space=pltpu.MemorySpace.VMEM)
    return pl.pallas_call(
        _lenet_kernel,
        out_shape=jax.ShapeDtypeStruct((n, F3), jnp.float32),
        in_specs=[vmem] * len(args),
        out_specs=vmem,
        cost_estimate=pl.CostEstimate(flops=flops, transcendentals=0,
                                      bytes_accessed=bytes_accessed),
    )(*args)


# -----------------------------------------------------------------------------
# Pure-JAX reference (for correctness check only)
# -----------------------------------------------------------------------------
def reference_forward(x, p):
    def conv(x, w, b):
        y = lax.conv_general_dilated(x, w, (1, 1), "VALID",
                                     dimension_numbers=("NCHW", "OIHW", "NCHW"))
        return jnp.maximum(y + b.reshape(1, -1, 1, 1), 0.0)

    def pool(x):
        return lax.reduce_window(x, -jnp.inf, lax.max,
                                 (1, 1, 2, 2), (1, 1, 2, 2), "VALID")

    x = pool(conv(x, p["conv1_w"], p["conv1_b"]))
    x = pool(conv(x, p["conv2_w"], p["conv2_b"]))
    x = x.reshape(x.shape[0], -1)
    x = jnp.maximum(x @ p["fc1_w"].T + p["fc1_b"], 0.0)
    x = jnp.maximum(x @ p["fc2_w"].T + p["fc2_b"], 0.0)
    return x @ p["fc3_w"].T + p["fc3_b"]


# -----------------------------------------------------------------------------
# Deterministic parameter init (PyTorch-like uniform(-1/sqrt(fan_in), ..))
# -----------------------------------------------------------------------------
def init_params(key):
    def u(key, shape, fan_in):
        bound = 1.0 / (fan_in ** 0.5)
        return jax.random.uniform(key, shape, jnp.float32, -bound, bound)

    ks = jax.random.split(key, 10)
    return {
        "conv1_w": u(ks[0], (6, 1, 5, 5), 1 * 5 * 5),
        "conv1_b": u(ks[1], (6,), 1 * 5 * 5),
        "conv2_w": u(ks[2], (16, 6, 5, 5), 6 * 5 * 5),
        "conv2_b": u(ks[3], (16,), 6 * 5 * 5),
        "fc1_w":   u(ks[4], (120, 400), 400),
        "fc1_b":   u(ks[5], (120,), 400),
        "fc2_w":   u(ks[6], (84, 120), 120),
        "fc2_b":   u(ks[7], (84,), 120),
        "fc3_w":   u(ks[8], (10, 84), 84),
        "fc3_b":   u(ks[9], (10,), 84),
    }


if __name__ == "__main__":
    key = jax.random.PRNGKey(0)
    kp, kx = jax.random.split(key)
    params = init_params(kp)

    n = 2
    prep = prepare_params(params, n)          # one-time host-side repack

    # LeNet geometry requires 32x32 spatial input: 16 * 5 * 5 = 400 after pooling.
    x = jax.random.normal(kx, (n, 1, 32, 32), jnp.float32)

    out = jax.block_until_ready(net_forward(x, prep))
    assert out.shape == (n, F3), out.shape

    ref = reference_forward(x, params)
    err = float(jnp.max(jnp.abs(out - ref)))
    assert jnp.allclose(out, ref, atol=2e-3, rtol=2e-3), err

    print("KERNEL_OK")
</pallas_src>

<mosaic_0001>
module attributes {stable_mosaic.version = 11 : i64} {
  func.func @_lenet_kernel(%arg0: memref<64x32xf32, #tpu.memory_space<vmem>>, %arg1: memref<5x32x168xf32, #tpu.memory_space<vmem>>, %arg2: memref<1x168xf32, #tpu.memory_space<vmem>>, %arg3: memref<28x59xf32, #tpu.memory_space<vmem>>, %arg4: memref<162x84xf32, #tpu.memory_space<vmem>>, %arg5: memref<5x84x160xf32, #tpu.memory_space<vmem>>, %arg6: memref<1x160xf32, #tpu.memory_space<vmem>>, %arg7: memref<10x23xf32, #tpu.memory_space<vmem>>, %arg8: memref<144x80xf32, #tpu.memory_space<vmem>>, %arg9: memref<400x120xf32, #tpu.memory_space<vmem>>, %arg10: memref<1x120xf32, #tpu.memory_space<vmem>>, %arg11: memref<120x84xf32, #tpu.memory_space<vmem>>, %arg12: memref<1x84xf32, #tpu.memory_space<vmem>>, %arg13: memref<84x10xf32, #tpu.memory_space<vmem>>, %arg14: memref<1x10xf32, #tpu.memory_space<vmem>>, %arg15: memref<2x10xf32, #tpu.memory_space<vmem>>) attributes {dimension_semantics = [], scalar_prefetch = 0 : i64, scratch_operands = 0 : i64, tpu.core_type = #tpu.core_type<tc>} {
    %c0 = arith.constant 0 : index
    %c0_0 = arith.constant 0 : index
    %0 = vector.load %arg0[%c0, %c0_0] : memref<64x32xf32, #tpu.memory_space<vmem>>, vector<64x32xf32>
    %1 = vector.extract_strided_slice %0 {offsets = [0, 0], sizes = [60, 32], strides = [1, 1]} : vector<64x32xf32> to vector<60x32xf32>
    %2 = vector.extract_strided_slice %0 {offsets = [1, 0], sizes = [60, 32], strides = [1, 1]} : vector<64x32xf32> to vector<60x32xf32>
    %3 = vector.extract_strided_slice %0 {offsets = [2, 0], sizes = [60, 32], strides = [1, 1]} : vector<64x32xf32> to vector<60x32xf32>
    %4 = vector.extract_strided_slice %0 {offsets = [3, 0], sizes = [60, 32], strides = [1, 1]} : vector<64x32xf32> to vector<60x32xf32>
    %5 = vector.extract_strided_slice %0 {offsets = [4, 0], sizes = [60, 32], strides = [1, 1]} : vector<64x32xf32> to vector<60x32xf32>
    %c0_1 = arith.constant 0 : index
    %c0_2 = arith.constant 0 : index
    %c0_3 = arith.constant 0 : index
    %6 = vector.load %arg1[%c0_1, %c0_2, %c0_3] : memref<5x32x168xf32, #tpu.memory_space<vmem>>, vector<1x32x168xf32>
    %7 = vector.shape_cast %6 : vector<1x32x168xf32> to vector<32x168xf32>
    %cst = arith.constant dense<0.000000e+00> : vector<60x168xf32>
    %8 = tpu.matmul %1, %7, %cst {dimension_numbers = #tpu.dot_dimension_numbers<[1], [0], [0], [1], [0, 0, 1, 1], [], []>} : vector<60x32xf32>, vector<32x168xf32>, vector<60x168xf32> -> vector<60x168xf32>
    %c1 = arith.constant 1 : index
    %c0_4 = arith.constant 0 : index
    %c0_5 = arith.constant 0 : index
    %9 = vector.load %arg1[%c1, %c0_4, %c0_5] : memref<5x32x168xf32, #tpu.memory_space<vmem>>, vector<1x32x168xf32>
    %10 = vector.shape_cast %9 : vector<1x32x168xf32> to vector<32x168xf32>
    %cst_6 = arith.constant dense<0.000000e+00> : vector<60x168xf32>
    %11 = tpu.matmul %2, %10, %cst_6 {dimension_numbers = #tpu.dot_dimension_numbers<[1], [0], [0], [1], [0, 0, 1, 1], [], []>} : vector<60x32xf32>, vector<32x168xf32>, vector<60x168xf32> -> vector<60x168xf32>
    %12 = arith.addf %8, %11 : vector<60x168xf32>
    %c2 = arith.constant 2 : index
    %c0_7 = arith.constant 0 : index
    %c0_8 = arith.constant 0 : index
    %13 = vector.load %arg1[%c2, %c0_7, %c0_8] : memref<5x32x168xf32, #tpu.memory_space<vmem>>, vector<1x32x168xf32>
    %14 = vector.shape_cast %13 : vector<1x32x168xf32> to vector<32x168xf32>
    %cst_9 = arith.constant dense<0.000000e+00> : vector<60x168xf32>
    %15 = tpu.matmul %3, %14, %cst_9 {dimension_numbers = #tpu.dot_dimension_numbers<[1], [0], [0], [1], [0, 0, 1, 1], [], []>} : vector<60x32xf32>, vector<32x168xf32>, vector<60x168xf32> -> vector<60x168xf32>
    %16 = arith.addf %12, %15 : vector<60x168xf32>
    %c3 = arith.constant 3 : index
    %c0_10 = arith.constant 0 : index
    %c0_11 = arith.constant 0 : index
    %17 = vector.load %arg1[%c3, %c0_10, %c0_11] : memref<5x32x168xf32, #tpu.memory_space<vmem>>, vector<1x32x168xf32>
    %18 = vector.shape_cast %17 : vector<1x32x168xf32> to vector<32x168xf32>
    %cst_12 = arith.constant dense<0.000000e+00> : vector<60x168xf32>
    %19 = tpu.matmul %4, %18, %cst_12 {dimension_numbers = #tpu.dot_dimension_numbers<[1], [0], [0], [1], [0, 0, 1, 1], [], []>} : vector<60x32xf32>, vector<32x168xf32>, vector<60x168xf32> -> vector<60x168xf32>
    %20 = arith.addf %16, %19 : vector<60x168xf32>
    %c4 = arith.constant 4 : index
    %c0_13 = arith.constant 0 : index
    %c0_14 = arith.constant 0 : index
    %21 = vector.load %arg1[%c4, %c0_13, %c0_14] : memref<5x32x168xf32, #tpu.memory_space<vmem>>, vector<1x32x168xf32>
    %22 = vector.shape_cast %21 : vector<1x32x168xf32> to vector<32x168xf32>
    %cst_15 = arith.constant dense<0.000000e+00> : vector<60x168xf32>
    %23 = tpu.matmul %5, %22, %cst_15 {dimension_numbers = #tpu.dot_dimension_numbers<[1], [0], [0], [1], [0, 0, 1, 1], [], []>} : vector<60x32xf32>, vector<32x168xf32>, vector<60x168xf32> -> vector<60x168xf32>
    %24 = arith.addf %20, %23 : vector<60x168xf32>
    %c0_16 = arith.constant 0 : index
    %c0_17 = arith.constant 0 : index
    %25 = vector.load %arg2[%c0_16, %c0_17] : memref<1x168xf32, #tpu.memory_space<vmem>>, vector<1x168xf32>
    %26 = vector.broadcast %25 : vector<1x168xf32> to vector<60x168xf32>
    %27 = arith.addf %24, %26 : vector<60x168xf32>
    %cst_18 = arith.constant 0.000000e+00 : f32
    %28 = vector.broadcast %cst_18 : f32 to vector<60x168xf32>
    %29 = arith.maximumf %27, %28 : vector<60x168xf32>
    %30 = vector.extract_strided_slice %29 {offsets = [0, 0], sizes = [59, 168], strides = [1, 1]} : vector<60x168xf32> to vector<59x168xf32>
    %31 = vector.extract_strided_slice %29 {offsets = [1, 0], sizes = [59, 168], strides = [1, 1]} : vector<60x168xf32> to vector<59x168xf32>
    %32 = arith.maximumf %30, %31 : vector<59x168xf32>
    %c0_19 = arith.constant 0 : index
    %c0_20 = arith.constant 0 : index
    %33 = vector.load %arg3[%c0_19, %c0_20] : memref<28x59xf32, #tpu.memory_space<vmem>>, vector<28x59xf32>
    %cst_21 = arith.constant dense<0.000000e+00> : vector<28x168xf32>
    %34 = tpu.matmul %33, %32, %cst_21 {dimension_numbers = #tpu.dot_dimension_numbers<[1], [0], [0], [1], [0, 0, 1, 1], [], []>} : vector<28x59xf32>, vector<59x168xf32>, vector<28x168xf32> -> vector<28x168xf32>
    %35 = vector.extract_strided_slice %34 {offsets = [0, 0], sizes = [28, 162], strides = [1, 1]} : vector<28x168xf32> to vector<28x162xf32>
    %36 = vector.extract_strided_slice %34 {offsets = [0, 6], sizes = [28, 162], strides = [1, 1]} : vector<28x168xf32> to vector<28x162xf32>
    %37 = arith.maximumf %35, %36 : vector<28x162xf32>
    %c0_22 = arith.constant 0 : index
    %c0_23 = arith.constant 0 : index
    %38 = vector.load %arg4[%c0_22, %c0_23] : memref<162x84xf32, #tpu.memory_space<vmem>>, vector<162x84xf32>
    %cst_24 = arith.constant dense<0.000000e+00> : vector<28x84xf32>
    %39 = tpu.matmul %37, %38, %cst_24 {dimension_numbers = #tpu.dot_dimension_numbers<[1], [0], [0], [1], [0, 0, 1, 1], [], []>} : vector<28x162xf32>, vector<162x84xf32>, vector<28x84xf32> -> vector<28x84xf32>
    %40 = vector.extract_strided_slice %39 {offsets = [0, 0], sizes = [24, 84], strides = [1, 1]} : vector<28x84xf32> to vector<24x84xf32>
    %41 = vector.extract_strided_slice %39 {offsets = [1, 0], sizes = [24, 84], strides = [1, 1]} : vector<28x84xf32> to vector<24x84xf32>
    %42 = vector.extract_strided_slice %39 {offsets = [2, 0], sizes = [24, 84], strides = [1, 1]} : vector<28x84xf32> to vector<24x84xf32>
    %43 = vector.extract_strided_slice %39 {offsets = [3, 0], sizes = [24, 84], strides = [1, 1]} : vector<28x84xf32> to vector<24x84xf32>
    %44 = vector.extract_strided_slice %39 {offsets = [4, 0], sizes = [24, 84], strides = [1, 1]} : vector<28x84xf32> to vector<24x84xf32>
    %c0_25 = arith.constant 0 : index
    %c0_26 = arith.constant 0 : index
    %c0_27 = arith.constant 0 : index
    %45 = vector.load %arg5[%c0_25, %c0_26, %c0_27] : memref<5x84x160xf32, #tpu.memory_space<vmem>>, vector<1x84x160xf32>
    %46 = vector.shape_cast %45 : vector<1x84x160xf32> to vector<84x160xf32>
    %cst_28 = arith.constant dense<0.000000e+00> : vector<24x160xf32>
    %47 = tpu.matmul %40, %46, %cst_28 {dimension_numbers = #tpu.dot_dimension_numbers<[1], [0], [0], [1], [0, 0, 1, 1], [], []>} : vector<24x84xf32>, vector<84x160xf32>, vector<24x160xf32> -> vector<24x160xf32>
    %c1_29 = arith.constant 1 : index
    %c0_30 = arith.constant 0 : index
    %c0_31 = arith.constant 0 : index
    %48 = vector.load %arg5[%c1_29, %c0_30, %c0_31] : memref<5x84x160xf32, #tpu.memory_space<vmem>>, vector<1x84x160xf32>
    %49 = vector.shape_cast %48 : vector<1x84x160xf32> to vector<84x160xf32>
    %cst_32 = arith.constant dense<0.000000e+00> : vector<24x160xf32>
    %50 = tpu.matmul %41, %49, %cst_32 {dimension_numbers = #tpu.dot_dimension_numbers<[1], [0], [0], [1], [0, 0, 1, 1], [], []>} : vector<24x84xf32>, vector<84x160xf32>, vector<24x160xf32> -> vector<24x160xf32>
    %51 = arith.addf %47, %50 : vector<24x160xf32>
    %c2_33 = arith.constant 2 : index
    %c0_34 = arith.constant 0 : index
    %c0_35 = arith.constant 0 : index
    %52 = vector.load %arg5[%c2_33, %c0_34, %c0_35] : memref<5x84x160xf32, #tpu.memory_space<vmem>>, vector<1x84x160xf32>
    %53 = vector.shape_cast %52 : vector<1x84x160xf32> to vector<84x160xf32>
    %cst_36 = arith.constant dense<0.000000e+00> : vector<24x160xf32>
    %54 = tpu.matmul %42, %53, %cst_36 {dimension_numbers = #tpu.dot_dimension_numbers<[1], [0], [0], [1], [0, 0, 1, 1], [], []>} : vector<24x84xf32>, vector<84x160xf32>, vector<24x160xf32> -> vector<24x160xf32>
    %55 = arith.addf %51, %54 : vector<24x160xf32>
    %c3_37 = arith.constant 3 : index
    %c0_38 = arith.constant 0 : index
    %c0_39 = arith.constant 0 : index
    %56 = vector.load %arg5[%c3_37, %c0_38, %c0_39] : memref<5x84x160xf32, #tpu.memory_space<vmem>>, vector<1x84x160xf32>
    %57 = vector.shape_cast %56 : vector<1x84x160xf32> to vector<84x160xf32>
    %cst_40 = arith.constant dense<0.000000e+00> : vector<24x160xf32>
    %58 = tpu.matmul %43, %57, %cst_40 {dimension_numbers = #tpu.dot_dimension_numbers<[1], [0], [0], [1], [0, 0, 1, 1], [], []>} : vector<24x84xf32>, vector<84x160xf32>, vector<24x160xf32> -> vector<24x160xf32>
    %59 = arith.addf %55, %58 : vector<24x160xf32>
    %c4_41 = arith.constant 4 : index
    %c0_42 = arith.constant 0 : index
    %c0_43 = arith.constant 0 : index
    %60 = vector.load %arg5[%c4_41, %c0_42, %c0_43] : memref<5x84x160xf32, #tpu.memory_space<vmem>>, vector<1x84x160xf32>
    %61 = vector.shape_cast %60 : vector<1x84x160xf32> to vector<84x160xf32>
    %cst_44 = arith.constant dense<0.000000e+00> : vector<24x160xf32>
    %62 = tpu.matmul %44, %61, %cst_44 {dimension_numbers = #tpu.dot_dimension_numbers<[1], [0], [0], [1], [0, 0, 1, 1], [], []>} : vector<24x84xf32>, vector<84x160xf32>, vector<24x160xf32> -> vector<24x160xf32>
    %63 = arith.addf %59, %62 : vector<24x160xf32>
    %c0_45 = arith.constant 0 : index
    %c0_46 = arith.constant 0 : index
    %64 = vector.load %arg6[%c0_45, %c0_46] : memref<1x160xf32, #tpu.memory_space<vmem>>, vector<1x160xf32>
    %65 = vector.broadcast %64 : vector<1x160xf32> to vector<24x160xf32>
    %66 = arith.addf %63, %65 : vector<24x160xf32>
    %cst_47 = arith.constant 0.000000e+00 : f32
    %67 = vector.broadcast %cst_47 : f32 to vector<24x160xf32>
    %68 = arith.maximumf %66, %67 : vector<24x160xf32>
    %69 = vector.extract_strided_slice %68 {offsets = [0, 0], sizes = [23, 160], strides = [1, 1]} : vector<24x160xf32> to vector<23x160xf32>
    %70 = vector.extract_strided_slice %68 {offsets = [1, 0], sizes = [23, 160], strides = [1, 1]} : vector<24x160xf32> to vector<23x160xf32>
    %71 = arith.maximumf %69, %70 : vector<23x160xf32>
    %c0_48 = arith.constant 0 : index
    %c0_49 = arith.constant 0 : index
    %72 = vector.load %arg7[%c0_48, %c0_49] : memref<10x23xf32, #tpu.memory_space<vmem>>, vector<10x23xf32>
    %cst_50 = arith.constant dense<0.000000e+00> : vector<10x160xf32>
    %73 = tpu.matmul %72, %71, %cst_50 {dimension_numbers = #tpu.dot_dimension_numbers<[1], [0], [0], [1], [0, 0, 1, 1], [], []>} : vector<10x23xf32>, vector<23x160xf32>, vector<10x160xf32> -> vector<10x160xf32>
    %74 = vector.extract_strided_slice %73 {offsets = [0, 0], sizes = [10, 144], strides = [1, 1]} : vector<10x160xf32> to vector<10x144xf32>
    %75 = vector.extract_strided_slice %73 {offsets = [0, 16], sizes = [10, 144], strides = [1, 1]} : vector<10x160xf32> to vector<10x144xf32>
    %76 = arith.maximumf %74, %75 : vector<10x144xf32>
    %c0_51 = arith.constant 0 : index
    %c0_52 = arith.constant 0 : index
    %77 = vector.load %arg8[%c0_51, %c0_52] : memref<144x80xf32, #tpu.memory_space<vmem>>, vector<144x80xf32>
    %cst_53 = arith.constant dense<0.000000e+00> : vector<10x80xf32>
    %78 = tpu.matmul %76, %77, %cst_53 {dimension_numbers = #tpu.dot_dimension_numbers<[1], [0], [0], [1], [0, 0, 1, 1], [], []>} : vector<10x144xf32>, vector<144x80xf32>, vector<10x80xf32> -> vector<10x80xf32>
    %79 = vector.extract_strided_slice %78 {offsets = [0, 0], sizes = [2, 80], strides = [1, 1]} : vector<10x80xf32> to vector<2x80xf32>
    %80 = vector.extract_strided_slice %78 {offsets = [2, 0], sizes = [2, 80], strides = [1, 1]} : vector<10x80xf32> to vector<2x80xf32>
    %81 = vector.extract_strided_slice %78 {offsets = [4, 0], sizes = [2, 80], strides = [1, 1]} : vector<10x80xf32> to vector<2x80xf32>
    %82 = vector.extract_strided_slice %78 {offsets = [6, 0], sizes = [2, 80], strides = [1, 1]} : vector<10x80xf32> to vector<2x80xf32>
    %83 = vector.extract_strided_slice %78 {offsets = [8, 0], sizes = [2, 80], strides = [1, 1]} : vector<10x80xf32> to vector<2x80xf32>
    %84 = tpu.concatenate %79, %80, %81, %82, %83 in 1 : vector<2x80xf32>, vector<2x80xf32>, vector<2x80xf32>, vector<2x80xf32>, vector<2x80xf32> -> vector<2x400xf32>
    %c0_54 = arith.constant 0 : index
    %c0_55 = arith.constant 0 : index
    %85 = vector.load %arg9[%c0_54, %c0_55] : memref<400x120xf32, #tpu.memory_space<vmem>>, vector<400x120xf32>
    %cst_56 = arith.constant dense<0.000000e+00> : vector<2x120xf32>
    %86 = tpu.matmul %84, %85, %cst_56 {dimension_numbers = #tpu.dot_dimension_numbers<[1], [0], [0], [1], [0, 0, 1, 1], [], []>} : vector<2x400xf32>, vector<400x120xf32>, vector<2x120xf32> -> vector<2x120xf32>
    %c0_57 = arith.constant 0 : index
    %c0_58 = arith.constant 0 : index
    %87 = vector.load %arg10[%c0_57, %c0_58] : memref<1x120xf32, #tpu.memory_space<vmem>>, vector<1x120xf32>
    %88 = vector.broadcast %87 : vector<1x120xf32> to vector<2x120xf32>
    %89 = arith.addf %86, %88 : vector<2x120xf32>
    %cst_59 = arith.constant 0.000000e+00 : f32
    %90 = vector.broadcast %cst_59 : f32 to vector<2x120xf32>
    %91 = arith.maximumf %89, %90 : vector<2x120xf32>
    %c0_60 = arith.constant 0 : index
    %c0_61 = arith.constant 0 : index
    %92 = vector.load %arg11[%c0_60, %c0_61] : memref<120x84xf32, #tpu.memory_space<vmem>>, vector<120x84xf32>
    %cst_62 = arith.constant dense<0.000000e+00> : vector<2x84xf32>
    %93 = tpu.matmul %91, %92, %cst_62 {dimension_numbers = #tpu.dot_dimension_numbers<[1], [0], [0], [1], [0, 0, 1, 1], [], []>} : vector<2x120xf32>, vector<120x84xf32>, vector<2x84xf32> -> vector<2x84xf32>
    %c0_63 = arith.constant 0 : index
    %c0_64 = arith.constant 0 : index
    %94 = vector.load %arg12[%c0_63, %c0_64] : memref<1x84xf32, #tpu.memory_space<vmem>>, vector<1x84xf32>
    %95 = vector.broadcast %94 : vector<1x84xf32> to vector<2x84xf32>
    %96 = arith.addf %93, %95 : vector<2x84xf32>
    %cst_65 = arith.constant 0.000000e+00 : f32
    %97 = vector.broadcast %cst_65 : f32 to vector<2x84xf32>
    %98 = arith.maximumf %96, %97 : vector<2x84xf32>
    %c0_66 = arith.constant 0 : index
    %c0_67 = arith.constant 0 : index
    %99 = vector.load %arg13[%c0_66, %c0_67] : memref<84x10xf32, #tpu.memory_space<vmem>>, vector<84x10xf32>
    %cst_68 = arith.constant dense<0.000000e+00> : vector<2x10xf32>
    %100 = tpu.matmul %98, %99, %cst_68 {dimension_numbers = #tpu.dot_dimension_numbers<[1], [0], [0], [1], [0, 0, 1, 1], [], []>} : vector<2x84xf32>, vector<84x10xf32>, vector<2x10xf32> -> vector<2x10xf32>
    %c0_69 = arith.constant 0 : index
    %c0_70 = arith.constant 0 : index
    %101 = vector.load %arg14[%c0_69, %c0_70] : memref<1x10xf32, #tpu.memory_space<vmem>>, vector<1x10xf32>
    %102 = vector.broadcast %101 : vector<1x10xf32> to vector<2x10xf32>
    %103 = arith.addf %100, %102 : vector<2x10xf32>
    %c0_71 = arith.constant 0 : index
    %c0_72 = arith.constant 0 : index
    %104 = vector.load %arg15[%c0_71, %c0_72] : memref<2x10xf32, #tpu.memory_space<vmem>>, vector<2x10xf32>
    tpu.vector_store %arg15[%c0_71, %c0_72], %103 {strides = array<i32>} : memref<2x10xf32, #tpu.memory_space<vmem>>, vector<2x10xf32>,
    return
  }
}

</mosaic_0001>

<bundles_post_ra>
// kernel: net_forward.1
= control target key start
LH: loop header
LB: loop body
LE: loop exit
PB: predicated region body
PF: predicated region fallthrough
CT: control target
= control target key end

     0   :  { %v3375_v7 = vmov 0.0   ;;  %vm368_vm0 = vcmask 1045504   ;;  %vm84_vm1 = vcmask 1046528   ;;  %vm100_vm2 = vcmask 261120   ;;  %s4795_s0 = inlined_call_operand.vmem [shape: f32[64,32], index: 0, kind: input, shape index: {}]   ;;  %s4796_s1 = inlined_call_operand.vmem [shape: f32[5,32,168], index: 1, kind: input, shape index: {}]   ;;  %s4797_s2 = inlined_call_operand.vmem [shape: f32[1,168], index: 2, kind: input, shape index: {}]   ;;  %s4798_s3 = inlined_call_operand.vmem [shape: f32[28,59], index: 3, kind: input, shape index: {}]   ;;  %s4799_s4 = inlined_call_operand.vmem [shape: f32[162,84], index: 4, kind: input, shape index: {}]   ;;  %s4800_s5 = inlined_call_operand.vmem [shape: f32[5,84,160], index: 5, kind: input, shape index: {}]   ;;  %s4801_s6 = inlined_call_operand.vmem [shape: f32[1,160], index: 6, kind: input, shape index: {}]   ;;  %s4802_s7 = inlined_call_operand.vmem [shape: f32[10,23], index: 7, kind: input, shape index: {}]   ;;  %s4803_s8 = inlined_call_operand.vmem [shape: f32[144,80], index: 8, kind: input, shape index: {}]   ;;  %s4804_s9 = inlined_call_operand.vmem [shape: f32[400,120], index: 9, kind: input, shape index: {}]   ;;  %s4805_s10 = inlined_call_operand.vmem [shape: f32[1,120], index: 10, kind: input, shape index: {}]   ;;  %s4806_s11 = inlined_call_operand.vmem [shape: f32[120,84], index: 11, kind: input, shape index: {}]   ;;  %s4807_s12 = inlined_call_operand.vmem [shape: f32[1,84], index: 12, kind: input, shape index: {}]   ;;  %s4808_s13 = inlined_call_operand.vmem [shape: f32[84,10], index: 13, kind: input, shape index: {}]   ;;  %s4809_s14 = inlined_call_operand.vmem [shape: f32[1,10], index: 14, kind: input, shape index: {}]   ;;  %s4810_s15 = inlined_call_operand.hbm [shape: f32[2,10], index: 15, kind: output, shape index: {}]  }
   0x1   :  { %v2610_v0 = vld [vmem:[%s4796_s1 + $0x48] sm:$0xff]  ;;  %v2612_v1 = vld [vmem:[%s4796_s1 + $0x58] sm:$0xff]  ;;  %v2609_v2 = vld [vmem:[%s4796_s1 + $0x40] sm:$0xff]  ;;  %181 = vmatprep.mubr.f32.mxu0 %v3375_v7  ;;  %1079 = vmatprep.mubr.f32.mxu1 %v3375_v7  ;;  %vm538_vm3 = vcmask 1044480  }
   0x2   :  { %v2939_v3 = vpack.c.bf16 %v2612_v1, %v2610_v0  ;;  %v2611_v4 = vld [vmem:[%s4796_s1 + $0x50] sm:$0xff]  ;;  %v2614_v5 = vld [vmem:[%s4796_s1 + $0x68] sm:$0xff]  ;;  %v2616_v6 = vld [vmem:[%s4796_s1 + $0x78] sm:$0xff] }
   0x3   :  { %v2941_v8 = vpack.c.bf16 %v2611_v4, %v2609_v2  ;;  %v2943_v9 = vpack.c.bf16 %v2616_v6, %v2614_v5  ;;  %v2613_v10 = vld [vmem:[%s4796_s1 + $0x60] sm:$0xff]  ;;  %v2615_v11 = vld [vmem:[%s4796_s1 + $0x70] sm:$0xff]  ;;  %v3499_v13 = vld [vmem:[%s4795_s0 + $0x8] sm:$0xff] }
   0x4   :  { %v3494_v12 = vld [vmem:[%s4795_s0] sm:$0xff]  ;;  %2940 = vmatprep.subr.bf16.mxu0 %v2939_v3  ;;  %v60_v14 = vld [vmem:[%s4796_s1 + $0x8] sm:$0xff]  ;;  %v2945_v16 = vpack.c.bf16 %v2615_v11, %v2613_v10  ;;  %v86_v18 = vrot.slane %v3499_v13, 1  ;;  %v3510_v19 = vld [vmem:[%s4795_s0 + $0x10] sm:$0xff]  ;;  %v370_v21 = vrot.slane %v3499_v13, 2  ;;  %v540_v44 = vrot.slane %v3499_v13, 3 }
   0x5   :  { %v369_v15 = vrot.slane %v3494_v12, 2  ;;  %2942 = vmatpush1.bf16.msra.mxu0 %v2941_v8  ;;  %v85_v17 = vrot.slane %v3494_v12, 1  ;;  %v62_v20 = vld [vmem:[%s4796_s1 + $0x18] sm:$0xff]  ;;  %v59_v23 = vld [vmem:[%s4796_s1] sm:$0xff]  ;;  %v61_v24 = vld [vmem:[%s4796_s1 + $0x10] sm:$0xff]  ;;  %v372_v25 = vrot.slane %v3510_v19, 2 }
   0x6   :  { %2944 = vmatprep.subr.bf16.mxu0 %v2943_v9  ;;  %v2947_v22 = vpack.c.bf16 %v62_v20, %v60_v14  ;;  %v64_v26 = vld [vmem:[%s4796_s1 + $0x28] sm:$0xff]  ;;  %v66_v27 = vld [vmem:[%s4796_s1 + $0x38] sm:$0xff]  ;;  %v88_v28 = vrot.slane %v3510_v19, 1  ;;  %v2949_v31 = vpack.c.bf16 %v61_v24, %v59_v23  ;;  %v3542_v33 = vld [vmem:[%s4795_s0 + $0x20] sm:$0xff]  ;;  %v539_v43 = vrot.slane %v3494_v12, 3 }
   0x7   :  { %v3531_v29 = vsel %vm368_vm0, %v369_v15, %v370_v21  ;;  %v87_v30 = vsel %vm84_vm1, %v85_v17, %v86_v18  ;;  %v3537_v32 = vld [vmem:[%s4795_s0 + $0x18] sm:$0xff]  ;;  %v3547_v34 = vld [vmem:[%s4795_s0 + $0x28] sm:$0xff]  ;;  %v2951_v35 = vpack.c.bf16 %v66_v27, %v64_v26  ;;  %v63_v36 = vld [vmem:[%s4796_s1 + $0x20] sm:$0xff]  ;;  %v3556_v38 = vsel %vm368_vm0, %v370_v21, %v372_v25 }
   0x8   :  { %v65_v37 = vld [vmem:[%s4796_s1 + $0x30] sm:$0xff]  ;;  %v2634_v40 = vld [vmem:[%s4796_s1 + $0x88] sm:$0xff]  ;;  %v2636_v41 = vld [vmem:[%s4796_s1 + $0x98] sm:$0xff]  ;;  %v374_v42 = vrot.slane %v3537_v32, 2  ;;  %v89_v45 = vsel %vm84_vm1, %v86_v18, %v88_v28  ;;  %v376_v47 = vrot.slane %v3542_v33, 2  ;;  %v378_v48 = vrot.slane %v3547_v34, 2 }
   0x9   :  { %2946 = vmatpush1.bf16.msra.mxu0 %v2945_v16  ;;  %v3561_v39 = vld [vmem:[%s4795_s0 + $0x30] sm:$0xff]  ;;  %v3577_v46 = vld [vmem:[%s4795_s0 + $0x38] sm:$0xff]  ;;  %v90_v50 = vrot.slane %v3537_v32, 1  ;;  %v2953_v51 = vpack.c.bf16 %v65_v37, %v63_v36  ;;  %v2955_v54 = vpack.c.bf16 %v2636_v41, %v2634_v40  ;;  %v3603_v59 = vsel %vm538_vm3, %v539_v43, %v540_v44 }
   0xa   :  { %2948 = vmatprep.subr.bf16.mxu0 %v2947_v22  ;;  %v380_v49 = vrot.slane %v3561_v39, 2  ;;  %v3585_v52 = vsel %vm368_vm0, %v372_v25, %v374_v42  ;;  %v382_v53 = vrot.slane %v3577_v46, 2  ;;  %v3589_v55 = vsel %vm368_vm0, %v374_v42, %v376_v47 }
   0xb   :  { %v3592_v56 = vsel %vm368_vm0, %v376_v47, %v378_v48  ;;  %v542_v60 = vrot.slane %v3510_v19, 3  ;;  %v92_v61 = vrot.slane %v3542_v33, 1  ;;  %v544_v62 = vrot.slane %v3537_v32, 3 }
   0xc   :  { %2617 = vmatmul.mubr.msk.f32.vlgmr.msra.gmra.mrb[0].mxu0 %vm100_vm2, %v87_v30  ;;  %v3595_v57 = vsel %vm368_vm0, %v378_v48, %v380_v49  ;;  %v3600_v58 = vsel %vm368_vm0, %v380_v49, %v382_v53  ;;  %v546_v63 = vrot.slane %v3542_v33, 3  ;;  %v91_v0 = vsel %vm84_vm1, %v88_v28, %v90_v50 }
   0xd   :  { %187 = vmatprep.mubr.f32.mxu0 %v3375_v7  ;;  %2950 = vmatpush1.bf16.msra.mxu0 %v2949_v31  ;;  %v3613_v1 = vsel %vm538_vm3, %v540_v44, %v542_v60  ;;  %v548_v2 = vrot.slane %v3547_v34, 3  ;;  %v550_v3 = vrot.slane %v3561_v39, 3 }
   0xe   :  { %2952 = vmatprep.subr.bf16.mxu0 %v2951_v35 }
  0x10   :  { %2618 = vmatmul.mubr.msk.f32.gmra.mrb[2].mxu0 %vm100_vm2, %v89_v45 }
  0x11   :  { %193 = vmatprep.mubr.f32.mxu0 %v3375_v7  ;;  %2954 = vmatpush1.bf16.msra.mxu0 %v2953_v51 }
  0x12   :  { %20 = vsyncpa [#allocation3], 0  ;;  %2956 = vmatprep.subr.bf16.mxu0 %v2955_v54  ;;  %v3618_v4 = vsel %vm538_vm3, %v542_v60, %v544_v62  ;;  %v3621_v5 = vsel %vm538_vm3, %v544_v62, %v546_v63  ;;  %v552_v6 = vrot.slane %v3577_v46, 3  ;;  %v3625_v8 = vsel %vm538_vm3, %v546_v63, %v548_v2  ;;  %v2633_v42 = vld [vmem:[%s4796_s1 + $0x80] sm:$0xff]  ;;  %v2635_v43 = vld [vmem:[%s4796_s1 + $0x90] sm:$0xff]  ;;  %s3378_s17 = smov 122  }
  0x13   :  { %v3628_v9 = vsel %vm538_vm3, %v548_v2, %v550_v3  ;;  %vm708_vm4 = vcmask 1043456   ;;  %v709_v10 = vrot.slane %v3494_v12, 4  ;;  %v710_v14 = vrot.slane %v3499_v13, 4  ;;  %v2638_v44 = vld [vmem:[%s4796_s1 + $0xa8] sm:$0xff]  ;;  %v2640_v45 = vld [vmem:[%s4796_s1 + $0xb8] sm:$0xff]  ;;  %v2637_v49 = vld [vmem:[%s4796_s1 + $0xa0] sm:$0xff] }
  0x14   :  { %2619 = vmatmul.mubr.msk.f32.gmra.mrb[4].mxu0 %vm100_vm2, %v91_v0  ;;  %v3635_v11 = vsel %vm538_vm3, %v550_v3, %v552_v6  ;;  %v712_v15 = vrot.slane %v3510_v19, 4  ;;  %v714_v16 = vrot.slane %v3537_v32, 4  ;;  %v93_v17 = vsel %vm84_vm1, %v90_v50, %v92_v61  ;;  %v2639_v50 = vld [vmem:[%s4796_s1 + $0xb0] sm:$0xff]  ;;  %v2650_v51 = vld [vmem:[%s4796_s1 + $0xc8] sm:$0xff]  ;;  %v2652_v54 = vld [vmem:[%s4796_s1 + $0xd8] sm:$0xff]  ;;  %s3379_s29 = smov 112  }
  0x15   :  { %199 = vmatprep.mubr.f32.mxu0 %v3375_v7  ;;  %v94_v18 = vrot.slane %v3547_v34, 1  ;;  %v716_v20 = vrot.slane %v3542_v33, 4  ;;  %v3645_v21 = vsel %vm708_vm4, %v709_v10, %v710_v14  ;;  %v96_v26 = vrot.slane %v3561_v39, 1  ;;  %v2655_v62 = vld [vmem:[%s4796_s1 + $0xf0] sm:$0xff]  ;;  %v2666_v63 = vld [vmem:[%s4796_s1 + $0x108] sm:$0xff]  ;;  %v2668_v0 = vld [vmem:[%s4796_s1 + $0x118] sm:$0xff] }
  0x16   :  { %v3648_v22 = vsel %vm708_vm4, %v710_v14, %v712_v15  ;;  %v3651_v23 = vsel %vm708_vm4, %v712_v15, %v714_v16  ;;  %v718_v27 = vrot.slane %v3547_v34, 4  ;;  %v98_v31 = vrot.slane %v3577_v46, 1  ;;  %v2671_v10 = vld [vmem:[%s4796_s1 + $0x130] sm:$0xff]  ;;  %s3381_s25 = smov 32   ;;  %s3382_s26 = smov 64  }
  0x17   :  { %v3654_v24 = vsel %vm708_vm4, %v714_v16, %v716_v20  ;;  %v95_v25 = vsel %vm84_vm1, %v92_v61, %v94_v18  ;;  %v97_v30 = vsel %vm84_vm1, %v94_v18, %v96_v26  ;;  %v720_v35 = vrot.slane %v3561_v39, 4 }
  0x18   :  { %2620 = vmatmul.mubr.msk.f32.gmra.mrb[6].mxu0 %vm100_vm2, %v93_v17  ;;  %v3662_v28 = vsel %vm708_vm4, %v716_v20, %v718_v27  ;;  %v99_v37 = vsel %vm84_vm1, %v96_v26, %v98_v31  ;;  %v722_v40 = vrot.slane %v3577_v46, 4  ;;  %v2957_v47 = vpack.c.bf16 %v2635_v43, %v2633_v42 }
  0x19   :  { %205 = vmatprep.mubr.f32.mxu0 %v3375_v7  ;;  %v3670_v36 = vsel %vm708_vm4, %v718_v27, %v720_v35  ;;  %v2959_v48 = vpack.c.bf16 %v2640_v45, %v2638_v44  ;;  %v2961_v60 = vpack.c.bf16 %v2639_v50, %v2637_v49  ;;  %v2963_v61 = vpack.c.bf16 %v2652_v54, %v2650_v51 }
  0x1a   :  { %v3679_v41 = vsel %vm708_vm4, %v720_v35, %v722_v40  ;;  %v2971_v3 = vpack.c.bf16 %v2668_v0, %v2666_v63  ;;  %vm1008_vm5 = vcmask 1042432   ;;  %vm3376_vm6 = vmmov 1  }
  0x1b   :  { %vm2992_vm7 = vmpackc.low %vm1008_vm5, %vm3376_vm6  ;;  %vm995_vm8 = vcmask 482304   ;;  %vm1183_vm9 = vcmask 1041408   ;;  %vm1128_vm10 = vcmask 998400   ;;  %vm1170_vm11 = vcmask 277504  }
  0x1c   :  { %2621 = vmatmul.mubr.msk.f32.gmra.mrb[8].mxu0 %vm100_vm2, %v95_v25  ;;  %vm1328_vm12 = vcmask 687104   ;;  %vm1966_vm13 = vcmask 187392   ;;  %vm2068_vm14 = vcmask 916480   ;;  %vm2097_vm15 = vcmask 130048  }
  0x1d   :  { %211 = vmatprep.mubr.f32.mxu0 %v3375_v7  ;;  %vm2593_vm5 = vcmask 74752  }
  0x20   :  { %2622 = vmatmul.mubr.msk.f32.gmra.mrb[10].mxu0 %vm100_vm2, %v97_v30 }
  0x21   :  { %217 = vmatprep.mubr.f32.mxu0 %v3375_v7 }
  0x24   :  { %2623 = vmatmul.mubr.msk.f32.gmra.mrb[12].mxu0 %vm100_vm2, %v99_v37 }
  0x25   :  { %223 = vmatprep.mubr.f32.mxu0 %v3375_v7 }
  0x28   :  { %2624 = vmatmul.mubr.msk.f32.gmra.mrb[14].mxu0 %vm100_vm2, %v98_v31 }
  0x29   :  { %310 = vmatprep.mubr.f32.mxu0 %v3375_v7 }
  0x2c   :  { %2625 = vmatmul.mubr.msk.f32.vlgmr.msra.gmra.mrb[0].mxu0 %vm100_vm2, %v3494_v12  ;;  %v2649_v12 = vld [vmem:[%s4796_s1 + $0xc0] sm:$0xff] }
  0x2d   :  { %316 = vmatprep.mubr.f32.mxu0 %v3375_v7  ;;  %2958 = vmatpush1.bf16.msra.mxu0 %v2957_v47 }
  0x2e   :  { %2960 = vmatprep.subr.bf16.mxu0 %v2959_v48 }
  0x30   :  { %2626 = vmatmul.mubr.msk.f32.gmra.mrb[2].mxu0 %vm100_vm2, %v3499_v13  ;;  %v2651_v13 = vld [vmem:[%s4796_s1 + $0xd0] sm:$0xff] }
  0x31   :  { %322 = vmatprep.mubr.f32.mxu0 %v3375_v7  ;;  %2962 = vmatpush1.bf16.msra.mxu0 %v2961_v60 }
  0x32   :  { %2964 = vmatprep.subr.bf16.mxu0 %v2963_v61 }
  0x34   :  { %2627 = vmatmul.mubr.msk.f32.gmra.mrb[4].mxu0 %vm100_vm2, %v3510_v19  ;;  %v2654_v19 = vld [vmem:[%s4796_s1 + $0xe8] sm:$0xff] }
  0x35   :  { %328 = vmatprep.mubr.f32.mxu0 %v3375_v7 }
  0x38   :  { %2628 = vmatmul.mubr.msk.f32.gmra.mrb[6].mxu0 %vm100_vm2, %v3537_v32  ;;  %v2656_v32 = vld [vmem:[%s4796_s1 + $0xf8] sm:$0xff] }
  0x39   :  { %334 = vmatprep.mubr.f32.mxu0 %v3375_v7 }
  0x3c   :  { %2629 = vmatmul.mubr.msk.f32.gmra.mrb[8].mxu0 %vm100_vm2, %v3542_v33  ;;  %v2965_v33 = vpack.c.bf16 %v2651_v13, %v2649_v12 }
  0x3d   :  { %340 = vmatprep.mubr.f32.mxu0 %v3375_v7 }
  0x40   :  { %2630 = vmatmul.mubr.msk.f32.gmra.mrb[10].mxu0 %vm100_vm2, %v3547_v34  ;;  %v2967_v34 = vpack.c.bf16 %v2656_v32, %v2654_v19 }
  0x41   :  { %346 = vmatprep.mubr.f32.mxu0 %v3375_v7 }
  0x44   :  { %2631 = vmatmul.mubr.msk.f32.gmra.mrb[12].mxu0 %vm100_vm2, %v3561_v39  ;;  %v2653_v39 = vld [vmem:[%s4796_s1 + $0xe0] sm:$0xff] }
  0x45   :  { %352 = vmatprep.mubr.f32.mxu0 %v3375_v7  ;;  %v2969_v2 = vpack.c.bf16 %v2655_v62, %v2653_v39 }
  0x48   :  { %2632 = vmatmul.mubr.msk.f32.gmra.mrb[14].mxu0 %vm100_vm2, %v3577_v46 }
  0x49   :  { %464 = vmatprep.mubr.f32.mxu0 %v3375_v7 }
  0x4c   :  { %2641 = vmatmul.mubr.msk.f32.vlgmr.msra.gmra.mrb[0].mxu0 %vm100_vm2, %v3531_v29  ;;  %v2665_v29 = vld [vmem:[%s4796_s1 + $0x100] sm:$0xff] }
  0x4d   :  { %470 = vmatprep.mubr.f32.mxu0 %v3375_v7  ;;  %2966 = vmatpush1.bf16.msra.mxu0 %v2965_v33 }
  0x4e   :  { %2968 = vmatprep.subr.bf16.mxu0 %v2967_v34 }
  0x50   :  { %2642 = vmatmul.mubr.msk.f32.gmra.mrb[2].mxu0 %vm100_vm2, %v3556_v38  ;;  %v2667_v38 = vld [vmem:[%s4796_s1 + $0x110] sm:$0xff] }
  0x51   :  { %476 = vmatprep.mubr.f32.mxu0 %v3375_v7  ;;  %2970 = vmatpush1.bf16.msra.mxu0 %v2969_v2 }
  0x52   :  { %2972 = vmatprep.subr.bf16.mxu0 %v2971_v3 }
  0x54   :  { %2643 = vmatmul.mubr.msk.f32.gmra.mrb[4].mxu0 %vm100_vm2, %v3585_v52  ;;  %v2670_v52 = vld [vmem:[%s4796_s1 + $0x128] sm:$0xff] }
  0x55   :  { %482 = vmatprep.mubr.f32.mxu0 %v3375_v7 }
  0x58   :  { %2644 = vmatmul.mubr.msk.f32.gmra.mrb[6].mxu0 %vm100_vm2, %v3589_v55  ;;  %v2672_v55 = vld [vmem:[%s4796_s1 + $0x138] sm:$0xff] }
  0x59   :  { %488 = vmatprep.mubr.f32.mxu0 %v3375_v7 }
  0x5c   :  { %2645 = vmatmul.mubr.msk.f32.gmra.mrb[8].mxu0 %vm100_vm2, %v3592_v56  ;;  %v2973_v56 = vpack.c.bf16 %v2667_v38, %v2665_v29 }
  0x5d   :  { %494 = vmatprep.mubr.f32.mxu0 %v3375_v7 }
  0x60   :  { %2646 = vmatmul.mubr.msk.f32.gmra.mrb[10].mxu0 %vm100_vm2, %v3595_v57  ;;  %v2975_v57 = vpack.c.bf16 %v2672_v55, %v2670_v52 }
  0x61   :  { %500 = vmatprep.mubr.f32.mxu0 %v3375_v7 }
  0x64   :  { %2647 = vmatmul.mubr.msk.f32.gmra.mrb[12].mxu0 %vm100_vm2, %v3600_v58  ;;  %v2669_v58 = vld [vmem:[%s4796_s1 + $0x120] sm:$0xff] }
  0x65   :  { %506 = vmatprep.mubr.f32.mxu0 %v3375_v7  ;;  %v2977_v14 = vpack.c.bf16 %v2671_v10, %v2669_v58 }
  0x68   :  { %2648 = vmatmul.mubr.msk.f32.gmra.mrb[14].mxu0 %vm100_vm2, %v382_v53  ;;  %v871_v53 = vlaneseq }
  0x69   :  { %634 = vmatprep.mubr.f32.mxu0 %v3375_v7 }
  0x6c   :  { %2657 = vmatmul.mubr.msk.f32.vlgmr.msra.gmra.mrb[0].mxu0 %vm100_vm2, %v3603_v59  ;;  %v3849_v59 = vshrl.u32 %v871_v53, 7 }
  0x6d   :  { %640 = vmatprep.mubr.f32.mxu0 %v3375_v7  ;;  %2974 = vmatpush1.bf16.msra.mxu0 %v2973_v56 }
  0x6e   :  { %2976 = vmatprep.subr.bf16.mxu0 %v2975_v57 }
  0x70   :  { %2658 = vmatmul.mubr.msk.f32.gmra.mrb[2].mxu0 %vm100_vm2, %v3613_v1  ;;  %v873_v1 = vsub.s32 0, %v3849_v59 }
  0x71   :  { %646 = vmatprep.mubr.f32.mxu0 %v3375_v7  ;;  %2978 = vmatpush1.bf16.msra.mxu0 %v2977_v14 }
  0x74   :  { %2659 = vmatmul.mubr.msk.f32.gmra.mrb[4].mxu0 %vm100_vm2, %v3618_v4  ;;  %v869_v4 = vld [vmem:[%s4797_s2] sm:$0x3] }
  0x75   :  { %652 = vmatprep.mubr.f32.mxu0 %v3375_v7 }
  0x78   :  { %2660 = vmatmul.mubr.msk.f32.gmra.mrb[6].mxu0 %vm100_vm2, %v3621_v5  ;;  %v877_v5 = vsub.s32 1, %v3849_v59 }
  0x79   :  { %658 = vmatprep.mubr.f32.mxu0 %v3375_v7 }
  0x7a   :  { %v3862_v46 = vrot.slane %v869_v4, %v877_v5 }
  0x7c   :  { %2661 = vmatmul.mubr.msk.f32.gmra.mrb[8].mxu0 %vm100_vm2, %v3625_v8 }
  0x7d   :  { %664 = vmatprep.mubr.f32.mxu0 %v3375_v7 }
  0x80   :  { %2662 = vmatmul.mubr.msk.f32.gmra.mrb[10].mxu0 %vm100_vm2, %v3628_v9 }
  0x81   :  { %670 = vmatprep.mubr.f32.mxu0 %v3375_v7 }
  0x84   :  { %2663 = vmatmul.mubr.msk.f32.gmra.mrb[12].mxu0 %vm100_vm2, %v3635_v11 }
  0x85   :  { %676 = vmatprep.mubr.f32.mxu0 %v3375_v7 }
  0x88   :  { %2664 = vmatmul.mubr.msk.f32.gmra.mrb[14].mxu0 %vm100_vm2, %v552_v6  ;;  %v3858_v6 = vrot.slane %v869_v4, %v873_v1 }
  0x89   :  { %804 = vmatprep.mubr.f32.mxu0 %v3375_v7 }
  0x8c   :  { %2673 = vmatmul.mubr.msk.f32.vlgmr.msra.gmra.mrb[0].mxu0 %vm100_vm2, %v3645_v21 }
  0x8d   :  { %810 = vmatprep.mubr.f32.mxu0 %v3375_v7 }
  0x90   :  { %2674 = vmatmul.mubr.msk.f32.gmra.mrb[2].mxu0 %vm100_vm2, %v3648_v22 }
  0x91   :  { %816 = vmatprep.mubr.f32.mxu0 %v3375_v7 }
  0x94   :  { %2675 = vmatmul.mubr.msk.f32.gmra.mrb[4].mxu0 %vm100_vm2, %v3651_v23 }
  0x95   :  { %822 = vmatprep.mubr.f32.mxu0 %v3375_v7 }
  0x98   :  { %2676 = vmatmul.mubr.msk.f32.gmra.mrb[6].mxu0 %vm100_vm2, %v3654_v24 }
  0x99   :  { %828 = vmatprep.mubr.f32.mxu0 %v3375_v7 }
  0x9c   :  { %2677 = vmatmul.mubr.msk.f32.gmra.mrb[8].mxu0 %vm100_vm2, %v3662_v28 }
  0x9d   :  { %834 = vmatprep.mubr.f32.mxu0 %v3375_v7 }
  0xa0   :  { %2678 = vmatmul.mubr.msk.f32.gmra.mrb[10].mxu0 %vm100_vm2, %v3670_v36 }
  0xa1   :  { %840 = vmatprep.mubr.f32.mxu0 %v3375_v7 }
  0xa4   :  { %2679 = vmatmul.mubr.msk.f32.gmra.mrb[12].mxu0 %vm100_vm2, %v3679_v41 }
  0xa5   :  { %846 = vmatprep.mubr.f32.mxu0 %v3375_v7 }
  0xa8   :  { %2680 = vmatmul.mubr.msk.f32.gmra.mrb[14].mxu0 %vm100_vm2, %v722_v40 }
 0x15f   :  { %v806_v8 = vpop.f32.mrb[0].mxu0 }
 0x160   :  { %v881_v9 = vadd.f32 %v3858_v6, %v806_v8  ;;  %v808_v11 = vpop.f32.mrb[1].mxu0 }
 0x161   :  { %v882_v15 = vadd.f32 %v3862_v46, %v808_v11 }
 0x162   :  { %v897_v17 = vmax.f32 %v881_v9, 0.0 }
 0x163   :  { %v812_v16 = vpop.f32.mrb[2].mxu0  ;;  %v898_v21 = vmax.f32 %v882_v15, 0.0 }
 0x164   :  { %v883_v18 = vadd.f32 %v3858_v6, %v812_v16  ;;  %v814_v20 = vpop.f32.mrb[3].mxu0  ;;  %v929_v26 = vrot.slane %v897_v17, 1 }
 0x165   :  { %v884_v22 = vadd.f32 %v3862_v46, %v814_v20  ;;  %v932_v31 = vrot.slane %v898_v21, 1 }
 0x166   :  { %v899_v23 = vmax.f32 %v883_v18, 0.0 }
 0x167   :  { %v900_v24 = vmax.f32 %v884_v22, 0.0  ;;  %v818_v25 = vpop.f32.mrb[4].mxu0 }
 0x168   :  { %v930_v27 = vrot.slane %v899_v23, 1  ;;  %v885_v28 = vadd.f32 %v3858_v6, %v818_v25  ;;  %v820_v30 = vpop.f32.mrb[5].mxu0 }
 0x169   :  { %v933_v35 = vrot.slane %v900_v24, 1  ;;  %v886_v36 = vadd.f32 %v3862_v46, %v820_v30 }
 0x16a   :  { %v901_v37 = vmax.f32 %v885_v28, 0.0  ;;  %v931_v40 = vsel %vm84_vm1, %v929_v26, %v930_v27 }
 0x16b   :  { %v902_v41 = vmax.f32 %v886_v36, 0.0  ;;  %v824_v42 = vpop.f32.mrb[6].mxu0  ;;  %v934_v43 = vsel %vm84_vm1, %v932_v31, %v933_v35  ;;  %v975_v44 = vmax.f32 %v897_v17, %v931_v40 }
 0x16c   :  { %v935_v45 = vrot.slane %v901_v37, 1  ;;  %v887_v47 = vadd.f32 %v3858_v6, %v824_v42  ;;  %v826_v48 = vpop.f32.mrb[7].mxu0  ;;  %v976_v49 = vmax.f32 %v898_v21, %v934_v43 }
 0x16d   :  { %v937_v50 = vrot.slane %v902_v41, 1  ;;  %v888_v51 = vadd.f32 %v3862_v46, %v826_v48 }
 0x16e   :  { %v903_v54 = vmax.f32 %v887_v47, 0.0  ;;  %v936_v60 = vsel %vm84_vm1, %v930_v27, %v935_v45 }
 0x16f   :  { %v904_v61 = vmax.f32 %v888_v51, 0.0  ;;  %v830_v12 = vpop.f32.mrb[8].mxu0  ;;  %v938_v13 = vsel %vm84_vm1, %v933_v35, %v937_v50  ;;  %v977_v19 = vmax.f32 %v899_v23, %v936_v60 }
 0x170   :  { %v939_v32 = vrot.slane %v903_v54, 1  ;;  %v889_v33 = vadd.f32 %v3858_v6, %v830_v12  ;;  %v832_v34 = vpop.f32.mrb[9].mxu0  ;;  %v978_v39 = vmax.f32 %v900_v24, %v938_v13 }
 0x171   :  { %v941_v62 = vrot.slane %v904_v61, 1  ;;  %v890_v63 = vadd.f32 %v3862_v46, %v832_v34  ;;  %v2981_v0 = vpack.c.bf16 %v977_v19, %v975_v44 }
 0x172   :  { %v905_v2 = vmax.f32 %v889_v33, 0.0  ;;  %v2979_v3 = vpack.c.bf16 %v978_v39, %v976_v49  ;;  %v940_v29 = vsel %vm84_vm1, %v935_v45, %v939_v32 }
 0x173   :  { %v906_v38 = vmax.f32 %v890_v63, 0.0  ;;  %v836_v52 = vpop.f32.mrb[10].mxu0  ;;  %v942_v55 = vsel %vm84_vm1, %v937_v50, %v941_v62  ;;  %v979_v56 = vmax.f32 %v901_v37, %v940_v29  ;;  %v992_v63 = vld [vmem:[%s4798_s3 + $0x8] sm:$0xff] }
 0x174   :  { %v943_v57 = vrot.slane %v905_v2, 1  ;;  %v891_v58 = vadd.f32 %v3858_v6, %v836_v52  ;;  %v838_v10 = vpop.f32.mrb[11].mxu0  ;;  %2980 = vmatprep.subr.bf16.mxu1 %v2979_v3  ;;  %v980_v14 = vmax.f32 %v902_v41, %v942_v55  ;;  %v1149_v3 = vld [vmem:[%s4799_s4] sm:$0xff]  ;;  %v1150_v29 = vld [vmem:[%s4799_s4 + $0x8] sm:$0xff]  ;;  %v3377_v52 = vmov 0.0|0.0  }
 0x175   :  { %v945_v53 = vrot.slane %v906_v38, 1  ;;  %v892_v4 = vadd.f32 %v3862_v46, %v838_v10  ;;  %2982 = vmatpush1.bf16.msra.mxu1 %v2981_v0  ;;  %v993_v0 = vld [vmem:[%s4798_s3 + $0x10] sm:$0xff]  ;;  %v2998_v55 = vpack.c.bf16 %v1150_v29, %v1149_v3  ;;  %3131 = vmatprep.subr.bf16.mxu0 %v3377_v52  ;;  %v1154_v10 = vld [vmem:[%s4799_s4 + $0x28] sm:$0xff] }
 0x176   :  { %v907_v8 = vmax.f32 %v891_v58, 0.0  ;;  %v944_v9 = vsel %vm84_vm1, %v939_v32, %v943_v57  ;;  %v1153_v58 = vld [vmem:[%s4799_s4 + $0x20] sm:$0xff] }
 0x177   :  { %v908_v11 = vmax.f32 %v892_v4, 0.0  ;;  %v842_v15 = vpop.f32.mrb[12].mxu0  ;;  %v946_v16 = vsel %vm84_vm1, %v941_v62, %v945_v53  ;;  %v981_v17 = vmax.f32 %v903_v54, %v944_v9  ;;  %v991_v62 = vld [vmem:[%s4798_s3] sm:$0xff]  ;;  %v1156_v4 = vld [vmem:[%s4799_s4 + $0x38] sm:$0xff] }
 0x178   :  { %v947_v18 = vrot.slane %v907_v8, 1  ;;  %v893_v20 = vadd.f32 %v3858_v6, %v842_v15  ;;  %v844_v21 = vpop.f32.mrb[13].mxu0  ;;  %v982_v22 = vmax.f32 %v904_v61, %v946_v16  ;;  %v1157_v9 = vld [vmem:[%s4799_s4 + $0x40] sm:$0xff]  ;;  %v1159_v16 = vld [vmem:[%s4799_s4 + $0x50] sm:$0xff] }
 0x179   :  { %v949_v23 = vrot.slane %v908_v11, 1  ;;  %v894_v24 = vadd.f32 %v3862_v46, %v844_v21  ;;  %v2985_v25 = vpack.c.bf16 %v981_v17, %v979_v56  ;;  %v1152_v56 = vld [vmem:[%s4799_s4 + $0x18] sm:$0xff]  ;;  %v1162_v21 = vld [vmem:[%s4799_s4 + $0x68] sm:$0xff] }
 0x17a   :  { %v909_v26 = vmax.f32 %v893_v20, 0.0  ;;  %v2983_v27 = vpack.c.bf16 %v982_v22, %v980_v14  ;;  %v948_v28 = vsel %vm84_vm1, %v943_v57, %v947_v18  ;;  %v3004_v14 = vpack.c.bf16 %v1154_v10, %v1153_v58  ;;  %v1160_v17 = vld [vmem:[%s4799_s4 + $0x58] sm:$0xff]  ;;  %v1161_v20 = vld [vmem:[%s4799_s4 + $0x60] sm:$0xff]  ;;  %v2700_v58 = vld [vmem:[%s4800_s5 + $0xf0] sm:$0xff] }
 0x17b   :  { %v910_v30 = vmax.f32 %v894_v24, 0.0  ;;  %v848_v31 = vpop.f32.mrb[14].mxu0  ;;  %v950_v35 = vsel %vm84_vm1, %v945_v53, %v949_v23  ;;  %v983_v36 = vmax.f32 %v905_v2, %v948_v28  ;;  %v994_v2 = vld [vmem:[%s4798_s3 + $0x18] sm:$0xf]  ;;  %v1155_v53 = vld [vmem:[%s4799_s4 + $0x30] sm:$0xff]  ;;  %v3016_v22 = vpack.c.bf16 %v1162_v21, %v1161_v20  ;;  %v2702_v10 = vld [vmem:[%s4800_s5 + $0x100] sm:$0xff] }
 0x17c   :  { %v951_v37 = vrot.slane %v909_v26, 1  ;;  %v895_v40 = vadd.f32 %v3858_v6, %v848_v31  ;;  %v850_v41 = vpop.f32.mrb[15].mxu0  ;;  %2984 = vmatprep.subr.bf16.mxu1 %v2983_v27  ;;  %v984_v42 = vmax.f32 %v906_v38, %v950_v35  ;;  %v1151_v38 = vld [vmem:[%s4799_s4 + $0x10] sm:$0xff]  ;;  %v1164_v24 = vld [vmem:[%s4799_s4 + $0x78] sm:$0xff]  ;;  %v1166_v27 = vld [vmem:[%s4799_s4 + $0x88] sm:$0xff] }
 0x17d   :  { %v953_v43 = vrot.slane %v910_v30, 1  ;;  %v896_v44 = vadd.f32 %v3862_v46, %v850_v41  ;;  %2986 = vmatpush1.bf16.msra.mxu1 %v2985_v25  ;;  %v3001_v57 = vpack.c.bf16 %v1152_v56, %v1151_v38  ;;  %v1168_v31 = vld [vmem:[%s4799_s4 + $0x98] sm:$0xff]  ;;  %v2706_v20 = vld [vmem:[%s4800_s5 + $0x120] sm:$0xff] }
 0x17e   :  { %v911_v45 = vmax.f32 %v895_v40, 0.0  ;;  %v952_v47 = vsel %vm84_vm1, %v947_v18, %v951_v37  ;;  %v3013_v18 = vpack.c.bf16 %v1160_v17, %v1159_v16 }
 0x17f   :  { %v912_v48 = vmax.f32 %v896_v44, 0.0  ;;  %v954_v49 = vsel %vm84_vm1, %v949_v23, %v953_v43  ;;  %v985_v50 = vmax.f32 %v907_v8, %v952_v47  ;;  %v3007_v8 = vpack.c.bf16 %v1156_v4, %v1155_v53  ;;  %v1163_v23 = vld [vmem:[%s4799_s4 + $0x70] sm:$0xff]  ;;  %v2695_v44 = vld [vmem:[%s4800_s5 + $0xc8] sm:$0xff] }
 0x180   :  { %v955_v51 = vrot.slane %v911_v45, 1  ;;  %v986_v54 = vmax.f32 %v908_v11, %v954_v49  ;;  %v1158_v11 = vld [vmem:[%s4799_s4 + $0x48] sm:$0xff]  ;;  %v3019_v25 = vpack.c.bf16 %v1164_v24, %v1163_v23 }
 0x181   :  { %v957_v60 = vrot.slane %v912_v48, 1  ;;  %v2989_v61 = vpack.c.bf16 %v985_v50, %v983_v36  ;;  %v3010_v15 = vpack.c.bf16 %v1158_v11, %v1157_v9  ;;  %v1169_v36 = vld [vmem:[%s4799_s4 + $0xa0] sm:$0x3]  ;;  %v2707_v53 = vld [vmem:[%s4800_s5 + $0x128] sm:$0xff]  ;;  %v3037_v11 = vpack.c.bf16 %v2702_v10, %v2700_v58  ;;  %v1282_v10 = vld [vmem:[%s4800_s5 + $0x50] sm:$0xff] }
 0x182   :  { %v956_v6 = vsel %vm84_vm1, %v951_v37, %v955_v51  ;;  %v989_v12 = vmax.f32 %v911_v45, %v955_v51  ;;  %v2987_v13 = vpack.c.bf16 %v986_v54, %v984_v42  ;;  %v2692_v54 = vld [vmem:[%s4800_s5 + $0xb0] sm:$0xff] }
 0x183   :  { %v987_v19 = vmax.f32 %v909_v26, %v956_v6  ;;  %v958_v46 = vsel %vm84_vm1, %v953_v43, %v957_v60  ;;  %v990_v32 = vmax.f32 %v912_v48, %v957_v60  ;;  %v1165_v26 = vld [vmem:[%s4799_s4 + $0x80] sm:$0xff]  ;;  %v2693_v43 = vld [vmem:[%s4800_s5 + $0xb8] sm:$0xff]  ;;  %v2699_v6 = vld [vmem:[%s4800_s5 + $0xe8] sm:$0xff] }
 0x184   :  { %v988_v33 = vmax.f32 %v910_v30, %v958_v46  ;;  %2988 = vmatprep.subr.bf16.mxu1 %v2987_v13  ;;  %v3022_v28 = vpack.c.bf16 %v1166_v27, %v1165_v26  ;;  %v1167_v30 = vld [vmem:[%s4799_s4 + $0x90] sm:$0xff]  ;;  %v3027_v47 = vpack.c.bf16 %v2695_v44, %v2693_v43  ;;  %v2694_v60 = vld [vmem:[%s4800_s5 + $0xc0] sm:$0xff]  ;;  %v2709_v26 = vld [vmem:[%s4800_s5 + $0x138] sm:$0xff] }
 0x185   :  { %v2994_v34 = vpack.c.bf16 %v989_v12, %v987_v19  ;;  %2990 = vmatpush1.bf16.msra.mxu1 %v2989_v61  ;;  %v3025_v35 = vpack.c.bf16 %v1168_v31, %v1167_v30  ;;  %v2697_v61 = vld [vmem:[%s4800_s5 + $0xd8] sm:$0xff]  ;;  %v2711_v27 = vld [vmem:[%s4800_s5 + $0x148] sm:$0xff]  ;;  %v2708_v30 = vld [vmem:[%s4800_s5 + $0x130] sm:$0xff] }
 0x186   :  { %v2991_v39 = vpack.c.bf16 %v990_v32, %v988_v33  ;;  %v3029_v32 = vpack.c.bf16 %v2694_v60, %v2692_v54  ;;  %v2710_v31 = vld [vmem:[%s4800_s5 + $0x140] sm:$0xff] }
 0x187   :  { %v1272_v44 = vld [vmem:[%s4800_s5] sm:$0xff] }
 0x188   :  { %2993 = vmatprep.subr.msk.bf16.mxu1 %vm2992_vm7, %v2991_v39  ;;  %v2696_v39 = vld [vmem:[%s4800_s5 + $0xd0] sm:$0xff] }
 0x189   :  { %2996 = vmatpush1.bf16.msk.msra.mxu1 %vm2992_vm7, %v2994_v34  ;;  %v3031_v34 = vpack.c.bf16 %v2699_v6, %v2697_v61 }
 0x18a   :  { %2997 = vmatprep.subr.bf16.mxu1 %v3377_v52 }
 0x18c   :  { %2683 = vmatmul.mubr.msk.f32.vlgmr.msra.gmra.mrb[0].mxu1 %vm995_vm8, %v991_v62  ;;  %v2698_v62 = vld [vmem:[%s4800_s5 + $0xe0] sm:$0xff] }
 0x18d   :  { %1085 = vmatprep.mubr.f32.mxu1 %v3375_v7  ;;  %2999 = vmatpush1.bf16.msra.mxu1 %v2998_v55  ;;  %v3033_v55 = vpack.c.bf16 %v2698_v62, %v2696_v39 }
 0x18e   :  { %3000 = vmatprep.subr.bf16.mxu1 %v3377_v52 }
 0x190   :  { %2684 = vmatmul.mubr.msk.f32.gmra.mrb[2].mxu1 %vm995_vm8, %v992_v63  ;;  %v2701_v63 = vld [vmem:[%s4800_s5 + $0xf8] sm:$0xff] }
 0x191   :  { %1091 = vmatprep.mubr.f32.mxu1 %v3375_v7  ;;  %3002 = vmatpush1.bf16.msra.mxu1 %v3001_v57 }
 0x192   :  { %3003 = vmatprep.subr.bf16.mxu1 %v3377_v52 }
 0x194   :  { %2685 = vmatmul.mubr.msk.f32.gmra.mrb[4].mxu1 %vm995_vm8, %v993_v0  ;;  %v2703_v0 = vld [vmem:[%s4800_s5 + $0x108] sm:$0xff] }
 0x195   :  { %1097 = vmatprep.mubr.f32.mxu1 %v3375_v7  ;;  %3005 = vmatpush1.bf16.msra.mxu1 %v3004_v14  ;;  %v3035_v57 = vpack.c.bf16 %v2703_v0, %v2701_v63  ;;  %v2705_v14 = vld [vmem:[%s4800_s5 + $0x118] sm:$0xff]  ;;  %v1281_v63 = vld [vmem:[%s4800_s5 + $0x48] sm:$0xff] }
 0x196   :  { %3006 = vmatprep.subr.bf16.mxu1 %v3377_v52  ;;  %v3039_v17 = vpack.c.bf16 %v2707_v53, %v2705_v14  ;;  %v1283_v0 = vld [vmem:[%s4800_s5 + $0x58] sm:$0xff] }
 0x198   :  { %2686 = vmatmul.mubr.msk.f32.gmra.mrb[6].mxu1 %vm995_vm8, %v994_v2 }
 0x199   :  { %3008 = vmatpush1.bf16.msra.mxu1 %v3007_v8 }
 0x19a   :  { %3009 = vmatprep.subr.bf16.mxu1 %v3377_v52 }
 0x19d   :  { %3011 = vmatpush1.bf16.msra.mxu1 %v3010_v15 }
 0x19e   :  { %3012 = vmatprep.subr.bf16.mxu1 %v3377_v52 }
 0x1a1   :  { %3014 = vmatpush1.bf16.msra.mxu1 %v3013_v18  ;;  %v2704_v18 = vld [vmem:[%s4800_s5 + $0x110] sm:$0xff] }
 0x1a2   :  { %3015 = vmatprep.subr.bf16.mxu1 %v3377_v52  ;;  %v3041_v24 = vpack.c.bf16 %v2706_v20, %v2704_v18 }
 0x1a5   :  { %3017 = vmatpush1.bf16.msra.mxu1 %v3016_v22 }
 0x1a6   :  { %3018 = vmatprep.subr.bf16.mxu1 %v3377_v52 }
 0x1a9   :  { %3020 = vmatpush1.bf16.msra.mxu1 %v3019_v25 }
 0x1aa   :  { %3021 = vmatprep.subr.bf16.mxu1 %v3377_v52 }
 0x1ad   :  { %3023 = vmatpush1.bf16.msra.mxu1 %v3022_v28  ;;  %v3043_v28 = vpack.c.bf16 %v2711_v27, %v2709_v26 }
 0x1ae   :  { %3024 = vmatprep.subr.bf16.mxu1 %v3377_v52 }
 0x1b1   :  { %3026 = vmatpush1.bf16.msra.mxu1 %v3025_v35  ;;  %v3045_v35 = vpack.c.bf16 %v2710_v31, %v2708_v30  ;;  %v1286_v30 = vld [vmem:[%s4800_s5 + $0x70] sm:$0xff] }
 0x1b2   :  { %1227 = vmatprep.subr.mxu1 %v3375_v7 }
 0x1b5   :  { %2687 = vmatpush1.msk.msra.mxu1 %vm1183_vm9, %v1169_v36  ;;  %v2713_v36 = vld [vmem:[%s4800_s5 + $0x158] sm:$0xf] }
 0x1b6   :  { %3028 = vmatprep.subr.bf16.mxu1 %v3027_v47 }
 0x25f   :  { %v1081_v37 = vpop.f32.mrb[0].mxu1 }
 0x260   :  { %1112 = vrot.lane.b32.xlu0 %v1081_v37, %s3378_s17  ;;  %v1083_v40 = vpop.f32.mrb[1].mxu1 }
 0x263   :  { %v1087_v41 = vpop.f32.mrb[2].mxu1 }
 0x264   :  { %1114 = vrot.lane.b32.xlu0 %v1083_v40, %s3378_s17  ;;  %1116 = vrot.lane.b32.xlu1 %v1087_v41, %s3378_s17  ;;  %v1089_v42 = vpop.f32.mrb[3].mxu1 }
 0x267   :  { %v1093_v45 = vpop.f32.mrb[4].mxu1 }
 0x268   :  { %1118 = vrot.lane.b32.xlu1 %v1089_v42, %s3378_s17  ;;  %v1095_v48 = vpop.f32.mrb[5].mxu1  ;;  %1120 = vrot.lane.b32.xlu0 %v1093_v45, %s3378_s17 }
 0x26b   :  { %v1099_v49 = vpop.f32.mrb[6].mxu1 }
 0x26c   :  { %1122 = vrot.lane.b32.xlu1 %v1095_v48, %s3378_s17  ;;  %v1101_v50 = vpop.f32.mrb[7].mxu1  ;;  %1124 = vrot.lane.b32.xlu0 %v1099_v49, %s3378_s17 }
 0x270   :  { %1126 = vrot.lane.b32.xlu1 %v1101_v50, %s3378_s17 }
 0x2d2   :  { %v1113_v51 = vpop.permute.xlu0 %1112 }
 0x2d6   :  { %v1115_v12 = vpop.permute.xlu0 %1114  ;;  %v1117_v13 = vpop.permute.xlu1 %1116 }
 0x2d7   :  { %v1129_v19 = vsel %vm1128_vm10, %v1113_v51, %v1115_v12  ;;  %v1142_v46 = vmax.f32 %v1083_v40, %v1115_v12  ;;  %v1275_v40 = vld [vmem:[%s4800_s5 + $0x18] sm:$0xff]  ;;  %v1276_v12 = vld [vmem:[%s4800_s5 + $0x20] sm:$0xff] }
 0x2d8   :  { %v1141_v33 = vmax.f32 %v1081_v37, %v1129_v19  ;;  %v1273_v37 = vld [vmem:[%s4800_s5 + $0x8] sm:$0xff] }
 0x2d9   :  { %2688 = vmatprep.mubr.msk.f32.mxu1 %vm1170_vm11, %v1142_v46 }
 0x2da   :  { %1252 = vmatmul.mubr.f32.vlgmr.msra.gmra.mrb[8].mxu1 %v1141_v33  ;;  %v1119_v2 = vpop.permute.xlu1 %1118  ;;  %v1121_v3 = vpop.permute.xlu0 %1120 }
 0x2db   :  { %v1130_v29 = vsel %vm1128_vm10, %v1117_v13, %v1119_v2  ;;  %v1144_v38 = vmax.f32 %v1089_v42, %v1119_v2  ;;  %3030 = vmatpush1.bf16.msra.mxu1 %v3029_v32  ;;  %v3047_v42 = vpack.c.bf16 %v1275_v40, %v1273_v37 }
 0x2dc   :  { %v1143_v56 = vmax.f32 %v1087_v41, %v1130_v29  ;;  %3032 = vmatprep.subr.bf16.mxu1 %v3031_v34  ;;  %v2712_v41 = vld [vmem:[%s4800_s5 + $0x150] sm:$0xf] }
 0x2dd   :  { %2689 = vmatprep.mubr.msk.f32.mxu1 %vm1170_vm11, %v1144_v38  ;;  %v1278_v34 = vld [vmem:[%s4800_s5 + $0x30] sm:$0xff] }
 0x2de   :  { %1257 = vmatmul.mubr.f32.gmra.mrb[10].mxu1 %v1143_v56  ;;  %v1123_v4 = vpop.permute.xlu1 %1122  ;;  %v1125_v16 = vpop.permute.xlu0 %1124  ;;  %v1280_v56 = vld [vmem:[%s4800_s5 + $0x40] sm:$0xff] }
 0x2df   :  { %v1131_v8 = vsel %vm1128_vm10, %v1121_v3, %v1123_v4  ;;  %v1146_v9 = vmax.f32 %v1095_v48, %v1123_v4  ;;  %3034 = vmatpush1.bf16.msra.mxu1 %v3033_v55  ;;  %v3053_v55 = vpack.c.bf16 %v1278_v34, %v1276_v12  ;;  %v2731_v12 = vld [vmem:[%s4800_s5 + $0x198] sm:$0xff]  ;;  %v2730_v34 = vld [vmem:[%s4800_s5 + $0x190] sm:$0xff] }
 0x2e0   :  { %v1145_v15 = vmax.f32 %v1093_v45, %v1131_v8  ;;  %3036 = vmatprep.subr.bf16.mxu1 %v3035_v57  ;;  %v1274_v45 = vld [vmem:[%s4800_s5 + $0x10] sm:$0xff]  ;;  %v3055_v8 = vpack.c.bf16 %v1283_v0, %v1281_v63 }
 0x2e1   :  { %2690 = vmatprep.mubr.msk.f32.mxu1 %vm1170_vm11, %v1146_v9  ;;  %v3049_v48 = vpack.c.bf16 %v1274_v45, %v1272_v44  ;;  %v1288_v45 = vld [vmem:[%s4800_s5 + $0x80] sm:$0xff] }
 0x2e2   :  { %1262 = vmatmul.mubr.f32.gmra.mrb[12].mxu1 %v1145_v15  ;;  %v1127_v21 = vpop.permute.xlu1 %1126  ;;  %v1287_v15 = vld [vmem:[%s4800_s5 + $0x78] sm:$0xff] }
 0x2e3   :  { %v1132_v22 = vsel %vm1128_vm10, %v1125_v16, %v1127_v21  ;;  %v1148_v23 = vmax.f32 %v1101_v50, %v1127_v21  ;;  %3038 = vmatpush1.bf16.msra.mxu1 %v3037_v11  ;;  %v1279_v50 = vld [vmem:[%s4800_s5 + $0x38] sm:$0xff]  ;;  %v1285_v11 = vld [vmem:[%s4800_s5 + $0x68] sm:$0xff]  ;;  %v3057_v21 = vpack.c.bf16 %v1282_v10, %v1280_v56  ;;  %v2734_v56 = vld [vmem:[%s4800_s5 + $0x1b0] sm:$0xff] }
 0x2e4   :  { %v1147_v25 = vmax.f32 %v1099_v49, %v1132_v22  ;;  %3040 = vmatprep.subr.bf16.mxu1 %v3039_v17  ;;  %v1277_v49 = vld [vmem:[%s4800_s5 + $0x28] sm:$0xff]  ;;  %v3059_v27 = vpack.c.bf16 %v1287_v15, %v1285_v11  ;;  %v2740_v11 = vld [vmem:[%s4800_s5 + $0x1e0] sm:$0xff]  ;;  %v2742_v15 = vld [vmem:[%s4800_s5 + $0x1f0] sm:$0xff] }
 0x2e5   :  { %2691 = vmatprep.mubr.msk.f32.mxu1 %vm1170_vm11, %v1148_v23  ;;  %v3051_v39 = vpack.c.bf16 %v1279_v50, %v1277_v49  ;;  %v1293_v49 = vld [vmem:[%s4800_s5 + $0xa8] sm:$0xf] }
 0x2e6   :  { %1267 = vmatmul.mubr.f32.gmra.mrb[14].mxu1 %v1147_v25  ;;  %v2725_v50 = vld [vmem:[%s4800_s5 + $0x168] sm:$0xff] }
 0x2e7   :  { %3042 = vmatpush1.bf16.msra.mxu1 %v3041_v24  ;;  %1405 = vmatprep.mubr.f32.mxu1 %v3375_v7 }
 0x2e8   :  { %3044 = vmatprep.subr.bf16.mxu1 %v3043_v28  ;;  %v1284_v28 = vld [vmem:[%s4800_s5 + $0x60] sm:$0xff] }
 0x2eb   :  { %3046 = vmatpush1.bf16.msra.mxu1 %v3045_v35  ;;  %v1289_v35 = vld [vmem:[%s4800_s5 + $0x88] sm:$0xff] }
 0x2ec   :  { %2714 = vmatprep.subr.msk.mxu1 %vm708_vm4, %v2713_v36  ;;  %v1291_v36 = vld [vmem:[%s4800_s5 + $0x98] sm:$0xff] }
 0x2ed   :  { %v3063_v44 = vpack.c.bf16 %v1291_v36, %v1289_v35  ;;  %v2755_v35 = vld [vmem:[%s4800_s5 + $0x230] sm:$0xff]  ;;  %v2757_v36 = vld [vmem:[%s4800_s5 + $0x240] sm:$0xff] }
 0x2ef   :  { %2715 = vmatpush1.msk.msra.mxu1 %vm708_vm4, %v2712_v41 }
 0x2f0   :  { %3048 = vmatprep.subr.bf16.mxu1 %v3047_v42  ;;  %v3061_v42 = vpack.c.bf16 %v1286_v30, %v1284_v28 }
 0x3ad   :  { %v4067_v43 = vpop.f32.mrb[8].mxu1 }
 0x3ae   :  { %v1255_v47 = vpop.f32.mrb[9].mxu1  ;;  %v1321_v51 = vrot.slane %v4067_v43, 1  ;;  %v1542_v54 = vrot.slane %v4067_v43, 2  ;;  %v1673_v60 = vrot.slane %v4067_v43, 3  ;;  %v1804_v61 = vrot.slane %v4067_v43, 4 }
 0x3af   :  { %v1290_v47 = vld [vmem:[%s4800_s5 + $0x90] sm:$0xff] }
 0x3b1   :  { %v4085_v6 = vpop.f32.mrb[10].mxu1 }
 0x3b2   :  { %v1322_v13 = vrot.slane %v4085_v6, 1  ;;  %v1543_v19 = vrot.slane %v4085_v6, 2  ;;  %v1674_v46 = vrot.slane %v4085_v6, 3  ;;  %v1805_v32 = vrot.slane %v4085_v6, 4  ;;  %v1260_v33 = vpop.f32.mrb[11].mxu1 }
 0x3b3   :  { %v2728_v33 = vld [vmem:[%s4800_s5 + $0x180] sm:$0xff] }
 0x3b4   :  { %v1323_v62 = vsel %vm84_vm1, %v1321_v51, %v1322_v13  ;;  %v4105_v2 = vsel %vm368_vm0, %v1542_v54, %v1543_v19  ;;  %v4108_v3 = vsel %vm538_vm3, %v1673_v60, %v1674_v46  ;;  %v4111_v29 = vsel %vm708_vm4, %v1804_v61, %v1805_v32  ;;  %v2727_v51 = vld [vmem:[%s4800_s5 + $0x178] sm:$0xff]  ;;  %v2724_v54 = vld [vmem:[%s4800_s5 + $0x160] sm:$0xff]  ;;  %v2726_v60 = vld [vmem:[%s4800_s5 + $0x170] sm:$0xff] }
 0x3b5   :  { %v4113_v38 = vpop.f32.mrb[12].mxu1  ;;  %2716 = vmatmul.mubr.msk.f32.vlgmr.msra.gmra.mrb[16].mxu1 %vm1328_vm12, %v1323_v62  ;;  %v2729_v61 = vld [vmem:[%s4800_s5 + $0x188] sm:$0xff]  ;;  %v2735_v62 = vld [vmem:[%s4800_s5 + $0x1b8] sm:$0xff]  ;;  %v3073_v63 = vpack.c.bf16 %v2730_v34, %v2728_v33 }
 0x3b6   :  { %3050 = vmatpush1.bf16.msra.mxu1 %v3049_v48  ;;  %v1265_v57 = vpop.f32.mrb[13].mxu1  ;;  %1411 = vmatprep.mubr.f32.mxu1 %v3375_v7  ;;  %v1324_v58 = vrot.slane %v4113_v38, 1  ;;  %v1545_v14 = vrot.slane %v4113_v38, 2  ;;  %v1676_v53 = vrot.slane %v4113_v38, 3  ;;  %v1807_v4 = vrot.slane %v4113_v38, 4  ;;  %v2779_v34 = vld [vmem:[%s4800_s5 + $0x2c8] sm:$0xff] }
 0x3b7   :  { %3052 = vmatprep.subr.bf16.mxu1 %v3051_v39  ;;  %v3065_v48 = vpack.c.bf16 %v1290_v47, %v1288_v45  ;;  %v2733_v39 = vld [vmem:[%s4800_s5 + $0x1a8] sm:$0xff]  ;;  %v3093_v45 = vpack.c.bf16 %v2757_v36, %v2755_v35 }
 0x3b8   :  { %v1325_v9 = vsel %vm84_vm1, %v1322_v13, %v1324_v58  ;;  %v4135_v16 = vsel %vm368_vm0, %v1543_v19, %v1545_v14  ;;  %v4138_v17 = vsel %vm538_vm3, %v1674_v46, %v1676_v53  ;;  %v4141_v18 = vsel %vm708_vm4, %v1805_v32, %v1807_v4  ;;  %v1292_v13 = vld [vmem:[%s4800_s5 + $0xa0] sm:$0xf]  ;;  %v2737_v57 = vld [vmem:[%s4800_s5 + $0x1c8] sm:$0xff] }
 0x3b9   :  { %v1268_v20 = vpop.f32.mrb[14].mxu1  ;;  %2717 = vmatmul.mubr.msk.f32.gmra.mrb[18].mxu1 %vm1328_vm12, %v1325_v9  ;;  %v3067_v19 = vpack.c.bf16 %v2727_v51, %v2725_v50  ;;  %v3069_v46 = vpack.c.bf16 %v2726_v60, %v2724_v54  ;;  %v3071_v32 = vpack.c.bf16 %v2731_v12, %v2729_v61  ;;  %v3075_v0 = vpack.c.bf16 %v2735_v62, %v2733_v39  ;;  %v2764_v50 = vld [vmem:[%s4800_s5 + $0x278] sm:$0xff]  ;;  %v2763_v60 = vld [vmem:[%s4800_s5 + $0x270] sm:$0xff]  ;;  %v2765_v61 = vld [vmem:[%s4800_s5 + $0x280] sm:$0xff] }
 0x3ba   :  { %v1326_v22 = vrot.slane %v1268_v20, 1  ;;  %v1547_v23 = vrot.slane %v1268_v20, 2  ;;  %v1678_v24 = vrot.slane %v1268_v20, 3  ;;  %v1809_v25 = vrot.slane %v1268_v20, 4  ;;  %3054 = vmatpush1.bf16.msra.mxu1 %v3053_v55  ;;  %v1270_v26 = vpop.f32.mrb[15].mxu1  ;;  %1417 = vmatprep.mubr.f32.mxu1 %v3375_v7  ;;  %v2732_v55 = vld [vmem:[%s4800_s5 + $0x1a0] sm:$0xff] }
 0x3bb   :  { %3056 = vmatprep.subr.bf16.mxu1 %v3055_v8  ;;  %v3085_v20 = vpack.c.bf16 %v2742_v15, %v2740_v11  ;;  %v2758_v26 = vld [vmem:[%s4800_s5 + $0x248] sm:$0xff]  ;;  %v2768_v12 = vld [vmem:[%s4800_s5 + $0x298] sm:$0xff]  ;;  %v2778_v62 = vld [vmem:[%s4800_s5 + $0x2c0] sm:$0xff] }
 0x3bc   :  { %v1327_v31 = vsel %vm84_vm1, %v1324_v58, %v1326_v22  ;;  %v4159_v37 = vsel %vm368_vm0, %v1545_v14, %v1547_v23  ;;  %v4162_v40 = vsel %vm538_vm3, %v1676_v53, %v1678_v24  ;;  %v4165_v41 = vsel %vm708_vm4, %v1807_v4, %v1809_v25  ;;  %v2736_v14 = vld [vmem:[%s4800_s5 + $0x1c0] sm:$0xff]  ;;  %v2738_v53 = vld [vmem:[%s4800_s5 + $0x1d0] sm:$0xff]  ;;  %v2741_v4 = vld [vmem:[%s4800_s5 + $0x1e8] sm:$0xff] }
 0x3bd   :  { %2718 = vmatmul.mubr.msk.f32.gmra.mrb[20].mxu1 %vm1328_vm12, %v1327_v31  ;;  %v3077_v58 = vpack.c.bf16 %v2734_v56, %v2732_v55  ;;  %v3081_v8 = vpack.c.bf16 %v2738_v53, %v2736_v14  ;;  %v2754_v22 = vld [vmem:[%s4800_s5 + $0x228] sm:$0xff]  ;;  %v2751_v23 = vld [vmem:[%s4800_s5 + $0x210] sm:$0xff]  ;;  %v2753_v24 = vld [vmem:[%s4800_s5 + $0x220] sm:$0xff]  ;;  %vm2196_vm0 = vcmask 654336   ;;  %vm2424_vm3 = vcmask 982016  }
 0x3be   :  { %3058 = vmatpush1.bf16.msra.mxu1 %v3057_v21  ;;  %1500 = vmatprep.mubr.f32.mxu1 %v3375_v7  ;;  %v2752_v21 = vld [vmem:[%s4800_s5 + $0x218] sm:$0xff]  ;;  %v3089_v30 = vpack.c.bf16 %v2753_v24, %v2751_v23  ;;  %v2771_v56 = vld [vmem:[%s4800_s5 + $0x2b0] sm:$0xf]  ;;  %v2787_v53 = vld [vmem:[%s4800_s5 + $0x308] sm:$0xff] }
 0x3bf   :  { %3060 = vmatprep.subr.bf16.mxu1 %v3059_v27  ;;  %v2756_v25 = vld [vmem:[%s4800_s5 + $0x238] sm:$0xff]  ;;  %v2744_v27 = vld [vmem:[%s4800_s5 + $0x200] sm:$0xf]  ;;  %v3087_v28 = vpack.c.bf16 %v2754_v22, %v2752_v21  ;;  %v2784_v14 = vld [vmem:[%s4800_s5 + $0x2f0] sm:$0xff] }
 0x3c0   :  { %v3091_v31 = vpack.c.bf16 %v2758_v26, %v2756_v25  ;;  %v2781_v39 = vld [vmem:[%s4800_s5 + $0x2d8] sm:$0xff]  ;;  %v2788_v11 = vld [vmem:[%s4800_s5 + $0x310] sm:$0xff]  ;;  %v2791_v15 = vld [vmem:[%s4800_s5 + $0x328] sm:$0xff] }
 0x3c1   :  { %v2785_v55 = vld [vmem:[%s4800_s5 + $0x2f8] sm:$0xff]  ;;  %v2790_v21 = vld [vmem:[%s4800_s5 + $0x320] sm:$0xff]  ;;  %v2792_v22 = vld [vmem:[%s4800_s5 + $0x330] sm:$0xff] }
 0x3c2   :  { %3062 = vmatpush1.bf16.msra.mxu1 %v3061_v42  ;;  %v2760_v42 = vld [vmem:[%s4800_s5 + $0x258] sm:$0xff]  ;;  %v2795_v23 = vld [vmem:[%s4800_s5 + $0x348] sm:$0xff]  ;;  %v3121_v24 = vpack.c.bf16 %v2792_v22, %v2790_v21  ;;  %v2794_v26 = vld [vmem:[%s4800_s5 + $0x340] sm:$0xff] }
 0x3c3   :  { %3064 = vmatprep.subr.bf16.mxu1 %v3063_v44  ;;  %v2762_v44 = vld [vmem:[%s4800_s5 + $0x268] sm:$0xff]  ;;  %v2086_v21 = vld [vmem:[%s4803_s8 + $0x38] sm:$0xff] }
 0x3c4   :  { %v3095_v47 = vpack.c.bf16 %v2762_v44, %v2760_v42 }
 0x3c6   :  { %3066 = vmatpush1.bf16.msra.mxu1 %v3065_v48  ;;  %v2759_v48 = vld [vmem:[%s4800_s5 + $0x250] sm:$0xff] }
 0x3c7   :  { %2719 = vmatprep.subr.msk.mxu1 %vm708_vm4, %v1293_v49  ;;  %v2761_v49 = vld [vmem:[%s4800_s5 + $0x260] sm:$0xff] }
 0x3c8   :  { %v3097_v51 = vpack.c.bf16 %v2761_v49, %v2759_v48 }
 0x3ca   :  { %2720 = vmatpush1.msk.msra.mxu1 %vm708_vm4, %v1292_v13  ;;  %v3101_v13 = vpack.c.bf16 %v2765_v61, %v2763_v60 }
 0x3cb   :  { %2721 = vmatmul.mubr.msk.f32.vlgmr.msra.gmra.mrb[16].mxu1 %vm1328_vm12, %v4067_v43  ;;  %3068 = vmatprep.subr.bf16.mxu1 %v3067_v19  ;;  %v2739_v43 = vld [vmem:[%s4800_s5 + $0x1d8] sm:$0xff] }
 0x3cc   :  { %3070 = vmatpush1.bf16.msra.mxu1 %v3069_v46  ;;  %1506 = vmatprep.mubr.f32.mxu1 %v3375_v7  ;;  %v3079_v10 = vpack.c.bf16 %v2739_v43, %v2737_v57  ;;  %v2767_v46 = vld [vmem:[%s4800_s5 + $0x290] sm:$0xff]  ;;  %v3107_v57 = vpack.c.bf16 %v2781_v39, %v2779_v34 }
 0x3cd   :  { %3072 = vmatprep.subr.bf16.mxu1 %v3071_v32  ;;  %v2769_v32 = vld [vmem:[%s4800_s5 + $0x2a0] sm:$0xff] }
 0x3ce   :  { %v3105_v33 = vpack.c.bf16 %v2769_v32, %v2767_v46 }
 0x3cf   :  { %2722 = vmatmul.mubr.msk.f32.gmra.mrb[18].mxu1 %vm1328_vm12, %v4085_v6  ;;  %v2743_v6 = vld [vmem:[%s4800_s5 + $0x1f8] sm:$0xff] }
 0x3d0   :  { %3074 = vmatpush1.bf16.msra.mxu1 %v3073_v63  ;;  %1512 = vmatprep.mubr.f32.mxu1 %v3375_v7  ;;  %v3083_v9 = vpack.c.bf16 %v2743_v6, %v2741_v4  ;;  %v2780_v63 = vld [vmem:[%s4800_s5 + $0x2d0] sm:$0xff]  ;;  %v2789_v4 = vld [vmem:[%s4800_s5 + $0x318] sm:$0xff] }
 0x3d1   :  { %3076 = vmatprep.subr.bf16.mxu1 %v3075_v0  ;;  %v2783_v0 = vld [vmem:[%s4800_s5 + $0x2e8] sm:$0xff]  ;;  %v3109_v43 = vpack.c.bf16 %v2780_v63, %v2778_v62 }
 0x3d3   :  { %2723 = vmatmul.mubr.msk.f32.gmra.mrb[20].mxu1 %vm1328_vm12, %v4113_v38  ;;  %v2745_v38 = vld [vmem:[%s4800_s5 + $0x208] sm:$0xf] }
 0x3d4   :  { %3078 = vmatpush1.bf16.msra.mxu1 %v3077_v58  ;;  %1625 = vmatprep.mubr.f32.mxu1 %v3375_v7  ;;  %v3111_v58 = vpack.c.bf16 %v2785_v55, %v2783_v0 }
 0x3d5   :  { %3080 = vmatprep.subr.bf16.mxu1 %v3079_v10  ;;  %v2782_v10 = vld [vmem:[%s4800_s5 + $0x2e0] sm:$0xff] }
 0x3d6   :  { %v3113_v6 = vpack.c.bf16 %v2784_v14, %v2782_v10  ;;  %v1964_v10 = vld [vmem:[%s4802_s7] sm:$0xff]  ;;  %v1965_v14 = vld [vmem:[%s4802_s7 + $0x8] sm:$0x3]  ;;  %s3380_s7 = smov 80  }
 0x3d8   :  { %3082 = vmatpush1.bf16.msra.mxu1 %v3081_v8  ;;  %v3115_v8 = vpack.c.bf16 %v2789_v4, %v2787_v53  ;;  %v2079_v53 = vld [vmem:[%s4803_s8] sm:$0xff]  ;;  %v2080_v4 = vld [vmem:[%s4803_s8 + $0x8] sm:$0xff] }
 0x3d9   :  { %3084 = vmatprep.subr.bf16.mxu1 %v3083_v9  ;;  %v2786_v9 = vld [vmem:[%s4800_s5 + $0x300] sm:$0xff] }
 0x3dc   :  { %3086 = vmatpush1.bf16.msra.mxu1 %v3085_v20  ;;  %v3117_v20 = vpack.c.bf16 %v2788_v11, %v2786_v9  ;;  %v2082_v9 = vld [vmem:[%s4803_s8 + $0x18] sm:$0xff] }
 0x3dd   :  { %2746 = vmatprep.subr.msk.mxu1 %vm708_vm4, %v2745_v38 }
 0x3e0   :  { %2747 = vmatpush1.msk.msra.mxu1 %vm708_vm4, %v2744_v27  ;;  %v2796_v27 = vld [vmem:[%s4800_s5 + $0x350] sm:$0xff] }
 0x3e1   :  { %2748 = vmatmul.mubr.msk.f32.vlgmr.msra.gmra.mrb[16].mxu1 %vm1328_vm12, %v4105_v2  ;;  %3088 = vmatprep.subr.bf16.mxu1 %v3087_v28  ;;  %v2766_v2 = vld [vmem:[%s4800_s5 + $0x288] sm:$0xff]  ;;  %v3125_v28 = vpack.c.bf16 %v2796_v27, %v2794_v26  ;;  %v2090_v26 = vld [vmem:[%s4803_s8 + $0x58] sm:$0xff] }
 0x3e2   :  { %3090 = vmatpush1.bf16.msra.mxu1 %v3089_v30  ;;  %1631 = vmatprep.mubr.f32.mxu1 %v3375_v7  ;;  %v3099_v54 = vpack.c.bf16 %v2766_v2, %v2764_v50  ;;  %v2798_v30 = vld [vmem:[%s4800_s5 + $0x360] sm:$0xf] }
 0x3e3   :  { %3092 = vmatprep.subr.bf16.mxu1 %v3091_v31  ;;  %v1912_v31 = vld [vmem:[%s4801_s6] sm:$0x3] }
 0x3e4   :  { %v1917_v35 = vrot.slane %v1912_v31, %v873_v1 }
 0x3e5   :  { %2749 = vmatmul.mubr.msk.f32.gmra.mrb[18].mxu1 %vm1328_vm12, %v4135_v16  ;;  %v2770_v16 = vld [vmem:[%s4800_s5 + $0x2a8] sm:$0xff] }
 0x3e6   :  { %3094 = vmatpush1.bf16.msra.mxu1 %v3093_v45  ;;  %1637 = vmatprep.mubr.f32.mxu1 %v3375_v7  ;;  %v3103_v19 = vpack.c.bf16 %v2770_v16, %v2768_v12 }
 0x3e7   :  { %3096 = vmatprep.subr.bf16.mxu1 %v3095_v47 }
 0x3e9   :  { %2750 = vmatmul.mubr.msk.f32.gmra.mrb[20].mxu1 %vm1328_vm12, %v4159_v37  ;;  %v2772_v37 = vld [vmem:[%s4800_s5 + $0x2b8] sm:$0xf] }
 0x3ea   :  { %3098 = vmatpush1.bf16.msra.mxu1 %v3097_v51  ;;  %1756 = vmatprep.mubr.f32.mxu1 %v3375_v7 }
 0x3eb   :  { %3100 = vmatprep.subr.bf16.mxu1 %v3099_v54 }
 0x3ee   :  { %3102 = vmatpush1.bf16.msra.mxu1 %v3101_v13 }
 0x3ef   :  { %3104 = vmatprep.subr.bf16.mxu1 %v3103_v19 }
 0x3f2   :  { %3106 = vmatpush1.bf16.msra.mxu1 %v3105_v33 }
 0x3f3   :  { %2773 = vmatprep.subr.msk.mxu1 %vm708_vm4, %v2772_v37 }
 0x3f6   :  { %2774 = vmatpush1.msk.msra.mxu1 %vm708_vm4, %v2771_v56 }
 0x3f7   :  { %2775 = vmatmul.mubr.msk.f32.vlgmr.msra.gmra.mrb[16].mxu1 %vm1328_vm12, %v4108_v3  ;;  %3108 = vmatprep.subr.bf16.mxu1 %v3107_v57  ;;  %v2793_v3 = vld [vmem:[%s4800_s5 + $0x338] sm:$0xff] }
 0x3f8   :  { %3110 = vmatpush1.bf16.msra.mxu1 %v3109_v43  ;;  %1762 = vmatprep.mubr.f32.mxu1 %v3375_v7  ;;  %v3119_v38 = vpack.c.bf16 %v2793_v3, %v2791_v15  ;;  %v2083_v15 = vld [vmem:[%s4803_s8 + $0x20] sm:$0xff]  ;;  %v2084_v3 = vld [vmem:[%s4803_s8 + $0x28] sm:$0xff] }
 0x3f9   :  { %3112 = vmatprep.subr.bf16.mxu1 %v3111_v58 }
 0x3fb   :  { %2776 = vmatmul.mubr.msk.f32.gmra.mrb[18].mxu1 %vm1328_vm12, %v4138_v17  ;;  %v2797_v17 = vld [vmem:[%s4800_s5 + $0x358] sm:$0xff] }
 0x3fc   :  { %3114 = vmatpush1.bf16.msra.mxu1 %v3113_v6  ;;  %1768 = vmatprep.mubr.f32.mxu1 %v3375_v7  ;;  %v3123_v25 = vpack.c.bf16 %v2797_v17, %v2795_v23  ;;  %v2081_v6 = vld [vmem:[%s4803_s8 + $0x10] sm:$0xff]  ;;  %v2087_v23 = vld [vmem:[%s4803_s8 + $0x40] sm:$0xff]  ;;  %v2088_v17 = vld [vmem:[%s4803_s8 + $0x48] sm:$0xff] }
 0x3fd   :  { %3116 = vmatprep.subr.bf16.mxu1 %v3115_v8  ;;  %v3132_v8 = vpack.c.bf16 %v2080_v4, %v2079_v53  ;;  %v3135_v11 = vpack.c.bf16 %v2082_v9, %v2081_v6  ;;  %v2208_v53 = vld [vmem:[%s4804_s9 + $0x30] sm:$0xff]  ;;  %v2209_v4 = vld [vmem:[%s4804_s9 + $0x38] sm:$0xff]  ;;  %v2226_v6 = vld [vmem:[%s4804_s9 + $0xc0] sm:$0xff] }
 0x3fe   :  { %v3172_v9 = vpack.c.bf16 %v2209_v4, %v2208_v53  ;;  %v2248_v53 = vld [vmem:[%s4804_s9 + $0x170] sm:$0xff]  ;;  %v2249_v4 = vld [vmem:[%s4804_s9 + $0x178] sm:$0xff] }
 0x3ff   :  { %2777 = vmatmul.mubr.msk.f32.gmra.mrb[20].mxu1 %vm1328_vm12, %v4162_v40  ;;  %v2799_v40 = vld [vmem:[%s4800_s5 + $0x368] sm:$0xf]  ;;  %3133 = vmatpush1.bf16.msra.mxu0 %v3132_v8 }
 0x400   :  { %3118 = vmatpush1.bf16.msra.mxu1 %v3117_v20  ;;  %1887 = vmatprep.mubr.f32.mxu1 %v3375_v7  ;;  %v3138_v20 = vpack.c.bf16 %v2084_v3, %v2083_v15  ;;  %v2227_v8 = vld [vmem:[%s4804_s9 + $0xc8] sm:$0xff]  ;;  %v2210_v15 = vld [vmem:[%s4804_s9 + $0x40] sm:$0xff] }
 0x401   :  { %3120 = vmatprep.subr.bf16.mxu1 %v3119_v38  ;;  %3134 = vmatprep.subr.bf16.mxu0 %v3377_v52  ;;  %v2085_v38 = vld [vmem:[%s4803_s8 + $0x30] sm:$0xff]  ;;  %v2211_v3 = vld [vmem:[%s4804_s9 + $0x48] sm:$0xff] }
 0x402   :  { %v3141_v22 = vpack.c.bf16 %v2086_v21, %v2085_v38  ;;  %v2229_v38 = vld [vmem:[%s4804_s9 + $0xd8] sm:$0xff]  ;;  %v3176_v21 = vpack.c.bf16 %v2211_v3, %v2210_v15  ;;  %v2402_v3 = vld [vmem:[%s4806_s11] sm:$0xff] }
 0x403   :  { %3136 = vmatpush1.bf16.msra.mxu0 %v3135_v11  ;;  %v3174_v11 = vpack.c.bf16 %v2227_v8, %v2226_v6  ;;  %v3212_v6 = vpack.c.bf16 %v2249_v4, %v2248_v53  ;;  %v2250_v8 = vld [vmem:[%s4804_s9 + $0x180] sm:$0xff] }
 0x404   :  { %3122 = vmatpush1.bf16.msra.mxu1 %v3121_v24  ;;  %3137 = vmatprep.subr.bf16.mxu0 %v3377_v52  ;;  %v3144_v24 = vpack.c.bf16 %v2088_v17, %v2087_v23  ;;  %v2212_v23 = vld [vmem:[%s4804_s9 + $0x50] sm:$0xff]  ;;  %v2213_v17 = vld [vmem:[%s4804_s9 + $0x58] sm:$0xff] }
 0x405   :  { %3124 = vmatprep.subr.bf16.mxu1 %v3123_v25  ;;  %v2089_v25 = vld [vmem:[%s4803_s8 + $0x50] sm:$0xff] }
 0x406   :  { %v3147_v27 = vpack.c.bf16 %v2090_v26, %v2089_v25  ;;  %v2231_v25 = vld [vmem:[%s4804_s9 + $0xe8] sm:$0xff]  ;;  %v3180_v26 = vpack.c.bf16 %v2213_v17, %v2212_v23  ;;  %v2406_v17 = vld [vmem:[%s4806_s11 + $0x20] sm:$0xff] }
 0x407   :  { %3139 = vmatpush1.bf16.msra.mxu0 %v3138_v20  ;;  %v2228_v20 = vld [vmem:[%s4804_s9 + $0xd0] sm:$0xff] }
 0x408   :  { %3126 = vmatpush1.bf16.msra.mxu1 %v3125_v28  ;;  %3140 = vmatprep.subr.bf16.mxu0 %v3377_v52  ;;  %v2091_v28 = vld [vmem:[%s4803_s8 + $0x60] sm:$0xff] }
 0x409   :  { %2800 = vmatprep.subr.msk.mxu1 %vm708_vm4, %v2799_v40  ;;  %v2092_v40 = vld [vmem:[%s4803_s8 + $0x68] sm:$0xff] }
 0x40b   :  { %3142 = vmatpush1.bf16.msra.mxu0 %v3141_v22  ;;  %v3178_v22 = vpack.c.bf16 %v2229_v38, %v2228_v20  ;;  %v2403_v20 = vld [vmem:[%s4806_s11 + $0x8] sm:$0xff]  ;;  %v2404_v38 = vld [vmem:[%s4806_s11 + $0x10] sm:$0xff] }
 0x40c   :  { %2801 = vmatpush1.msk.msra.mxu1 %vm708_vm4, %v2798_v30  ;;  %3143 = vmatprep.subr.bf16.mxu0 %v3377_v52  ;;  %v3150_v30 = vpack.c.bf16 %v2092_v40, %v2091_v28  ;;  %v2214_v28 = vld [vmem:[%s4804_s9 + $0x60] sm:$0xff]  ;;  %v2215_v40 = vld [vmem:[%s4804_s9 + $0x68] sm:$0xff] }
 0x40d   :  { %2802 = vmatmul.mubr.msk.f32.vlgmr.msra.gmra.mrb[16].mxu1 %vm1328_vm12, %v4111_v29  ;;  %v1921_v29 = vrot.slane %v1912_v31, %v877_v5  ;;  %v2093_v31 = vld [vmem:[%s4803_s8 + $0x70] sm:$0xff] }
 0x40e   :  { %1893 = vmatprep.mubr.f32.mxu1 %v3375_v7 }
 0x40f   :  { %3145 = vmatpush1.bf16.msra.mxu0 %v3144_v24  ;;  %v2230_v24 = vld [vmem:[%s4804_s9 + $0xe0] sm:$0xff] }
 0x410   :  { %3146 = vmatprep.subr.bf16.mxu0 %v3377_v52 }
 0x411   :  { %2803 = vmatmul.mubr.msk.f32.gmra.mrb[18].mxu1 %vm1328_vm12, %v4141_v18 }
 0x412   :  { %1899 = vmatprep.mubr.f32.mxu1 %v3375_v7 }
 0x413   :  { %3148 = vmatpush1.bf16.msra.mxu0 %v3147_v27  ;;  %v3182_v27 = vpack.c.bf16 %v2231_v25, %v2230_v24  ;;  %v2407_v24 = vld [vmem:[%s4806_s11 + $0x28] sm:$0xff] }
 0x414   :  { %3149 = vmatprep.subr.bf16.mxu0 %v3377_v52  ;;  %v3224_v25 = vpack.c.bf16 %v2407_v24, %v2406_v17 }
 0x415   :  { %2804 = vmatmul.mubr.msk.f32.gmra.mrb[20].mxu1 %vm1328_vm12, %v4165_v41 }
 0x416   :  { %2043 = vmatprep.mubr.f32.mxu1 %v3375_v7 }
 0x417   :  { %3151 = vmatpush1.bf16.msra.mxu0 %v3150_v30  ;;  %v3184_v30 = vpack.c.bf16 %v2215_v40, %v2214_v28  ;;  %v2410_v40 = vld [vmem:[%s4806_s11 + $0x40] sm:$0xff] }
 0x418   :  { %3152 = vmatprep.subr.bf16.mxu0 %v3377_v52 }
 0x4e0   :  { %v1889_v36 = vpop.f32.mrb[16].mxu1 }
 0x4e1   :  { %v1924_v42 = vadd.f32 %v1917_v35, %v1889_v36  ;;  %v1891_v18 = vpop.f32.mrb[17].mxu1  ;;  %v2095_v36 = vld [vmem:[%s4803_s8 + $0x80] sm:$0xff] }
 0x4e2   :  { %v1925_v44 = vadd.f32 %v1921_v29, %v1891_v18 }
 0x4e3   :  { %v1930_v47 = vmax.f32 %v1924_v42, 0.0  ;;  %v2096_v42 = vld [vmem:[%s4803_s8 + $0x88] sm:$0xff] }
 0x4e4   :  { %v1895_v45 = vpop.f32.mrb[18].mxu1  ;;  %v1931_v49 = vmax.f32 %v1925_v44, 0.0  ;;  %v3156_v18 = vpack.c.bf16 %v2096_v42, %v2095_v36  ;;  %v2216_v36 = vld [vmem:[%s4804_s9 + $0x70] sm:$0xff]  ;;  %v2217_v42 = vld [vmem:[%s4804_s9 + $0x78] sm:$0xff] }
 0x4e5   :  { %v1926_v48 = vadd.f32 %v1917_v35, %v1895_v45  ;;  %v1897_v41 = vpop.f32.mrb[19].mxu1  ;;  %v1942_v60 = vrot.slane %v1930_v47, 1 }
 0x4e6   :  { %v1927_v50 = vadd.f32 %v1921_v29, %v1897_v41  ;;  %v1945_v16 = vrot.slane %v1931_v49, 1 }
 0x4e7   :  { %v1932_v2 = vmax.f32 %v1926_v48, 0.0 }
 0x4e8   :  { %v1933_v51 = vmax.f32 %v1927_v50, 0.0  ;;  %v1901_v54 = vpop.f32.mrb[20].mxu1 }
 0x4e9   :  { %v1943_v61 = vrot.slane %v1932_v2, 1  ;;  %v1928_v12 = vadd.f32 %v1917_v35, %v1901_v54  ;;  %v1903_v1 = vpop.f32.mrb[21].mxu1  ;;  %v2094_v35 = vld [vmem:[%s4803_s8 + $0x78] sm:$0xff] }
 0x4ea   :  { %v1946_v59 = vrot.slane %v1933_v51, 1  ;;  %v1929_v5 = vadd.f32 %v1921_v29, %v1903_v1  ;;  %v3153_v29 = vpack.c.bf16 %v2094_v35, %v2093_v31  ;;  %v2232_v31 = vld [vmem:[%s4804_s9 + $0xf0] sm:$0xff]  ;;  %v2233_v35 = vld [vmem:[%s4804_s9 + $0xf8] sm:$0xff] }
 0x4eb   :  { %v1944_v13 = vsel %vm84_vm1, %v1942_v60, %v1943_v61  ;;  %v1934_v19 = vmax.f32 %v1928_v12, 0.0 }
 0x4ec   :  { %v1958_v46 = vmax.f32 %v1930_v47, %v1944_v13  ;;  %v1935_v32 = vmax.f32 %v1929_v5, 0.0  ;;  %v1947_v33 = vsel %vm84_vm1, %v1945_v16, %v1946_v59  ;;  %3154 = vmatpush1.bf16.msra.mxu0 %v3153_v29  ;;  %v2218_v16 = vld [vmem:[%s4804_s9 + $0x80] sm:$0xff]  ;;  %v3186_v29 = vpack.c.bf16 %v2233_v35, %v2232_v31  ;;  %v2412_v35 = vld [vmem:[%s4806_s11 + $0x50] sm:$0xff] }
 0x4ed   :  { %v1948_v37 = vrot.slane %v1934_v19, 1  ;;  %v1959_v34 = vmax.f32 %v1931_v49, %v1947_v33  ;;  %3155 = vmatprep.subr.bf16.mxu0 %v3377_v52  ;;  %v2202_v5 = vld [vmem:[%s4804_s9] sm:$0xff] }
 0x4ee   :  { %v1950_v39 = vrot.slane %v1935_v32, 1 }
 0x4ef   :  { %v1949_v62 = vsel %vm84_vm1, %v1943_v61, %v1948_v37  ;;  %v1962_v58 = vmax.f32 %v1934_v19, %v1948_v37  ;;  %v2203_v19 = vld [vmem:[%s4804_s9 + $0x8] sm:$0xff] }
 0x4f0   :  { %v1960_v63 = vmax.f32 %v1932_v2, %v1949_v62  ;;  %v1951_v0 = vsel %vm84_vm1, %v1946_v59, %v1950_v39  ;;  %v1963_v43 = vmax.f32 %v1935_v32, %v1950_v39  ;;  %3157 = vmatpush1.bf16.msra.mxu0 %v3156_v18  ;;  %v2219_v59 = vld [vmem:[%s4804_s9 + $0x88] sm:$0xff]  ;;  %v2221_v32 = vld [vmem:[%s4804_s9 + $0x98] sm:$0xff]  ;;  %v3160_v33 = vpack.c.bf16 %v2203_v19, %v2202_v5  ;;  %v2222_v62 = vld [vmem:[%s4804_s9 + $0xa0] sm:$0xff] }
 0x4f1   :  { %v1961_v55 = vmax.f32 %v1933_v51, %v1951_v0  ;;  %3217 = vmatprep.subr.bf16.mxu0 %v3377_v52  ;;  %v3158_v13 = vpack.c.bf16 %v2219_v59, %v2218_v16  ;;  %v2205_v39 = vld [vmem:[%s4804_s9 + $0x18] sm:$0xff]  ;;  %v3188_v18 = vpack.c.bf16 %v2217_v42, %v2216_v36  ;;  %v2236_v59 = vld [vmem:[%s4804_s9 + $0x110] sm:$0xff]  ;;  %v2414_v42 = vld [vmem:[%s4806_s11 + $0x60] sm:$0xff] }
 0x4f2   :  { %v3129_v56 = vpack.c.bf16 %v1960_v63, %v1958_v46  ;;  %v2220_v46 = vld [vmem:[%s4804_s9 + $0x90] sm:$0xff]  ;;  %v2223_v63 = vld [vmem:[%s4804_s9 + $0xa8] sm:$0xff]  ;;  %v2237_v5 = vld [vmem:[%s4804_s9 + $0x118] sm:$0xff] }
 0x4f3   :  { %v3127_v57 = vpack.c.bf16 %v1961_v55, %v1959_v34  ;;  %v3162_v37 = vpack.c.bf16 %v2221_v32, %v2220_v46  ;;  %v2204_v34 = vld [vmem:[%s4804_s9 + $0x10] sm:$0xff]  ;;  %v3166_v55 = vpack.c.bf16 %v2223_v63, %v2222_v62  ;;  %v3194_v46 = vpack.c.bf16 %v2237_v5, %v2236_v59  ;;  %v2238_v32 = vld [vmem:[%s4804_s9 + $0x120] sm:$0xff]  ;;  %v2502_v59 = vld [vmem:[%s4808_s13 + $0x18] sm:$0xff] }
 0x4f4   :  { %v3164_v0 = vpack.c.bf16 %v2205_v39, %v2204_v34  ;;  %v2240_v34 = vld [vmem:[%s4804_s9 + $0x130] sm:$0xff]  ;;  %v2241_v39 = vld [vmem:[%s4804_s9 + $0x138] sm:$0xff]  ;;  %v2242_v63 = vld [vmem:[%s4804_s9 + $0x140] sm:$0xff] }
 0x4f5   :  { %3128 = vmatprep.subr.bf16.mxu1 %v3127_v57  ;;  %v2207_v57 = vld [vmem:[%s4804_s9 + $0x28] sm:$0xff]  ;;  %v3200_v62 = vpack.c.bf16 %v2241_v39, %v2240_v34  ;;  %v2507_v34 = vld [vmem:[%s4808_s13 + $0x40] sm:$0xff] }
 0x4f6   :  { %3130 = vmatpush1.bf16.msra.mxu1 %v3129_v56  ;;  %v2206_v56 = vld [vmem:[%s4804_s9 + $0x20] sm:$0xff]  ;;  %v2508_v39 = vld [vmem:[%s4808_s13 + $0x48] sm:$0xff] }
 0x4f7   :  { %2805 = vmatprep.subr.msk.mxu1 %vm84_vm1, %v1963_v43  ;;  %v2224_v43 = vld [vmem:[%s4804_s9 + $0xb0] sm:$0xff] }
 0x4fa   :  { %2806 = vmatpush1.msk.msra.mxu1 %vm84_vm1, %v1962_v58  ;;  %v2225_v58 = vld [vmem:[%s4804_s9 + $0xb8] sm:$0xff]  ;;  %vm2200_vm1 = vcmask 523264  }
 0x4fb   :  { %2807 = vmatmul.mubr.msk.f32.vlgmr.msra.gmra.mrb[22].mxu1 %vm1966_vm13, %v1964_v10  ;;  %3159 = vmatprep.subr.bf16.mxu1 %v3158_v13  ;;  %v3168_v10 = vpack.c.bf16 %v2207_v57, %v2206_v56  ;;  %v2244_v56 = vld [vmem:[%s4804_s9 + $0x150] sm:$0xff]  ;;  %v2245_v57 = vld [vmem:[%s4804_s9 + $0x158] sm:$0xff] }
 0x4fc   :  { %2049 = vmatprep.mubr.f32.mxu1 %v3375_v7  ;;  %3161 = vmatpush3.bf16.msra.mxu1 %v3160_v33  ;;  %v2239_v33 = vld [vmem:[%s4804_s9 + $0x128] sm:$0xff] }
 0x4fd   :  { %3163 = vmatprep.subr.bf16.mxu1 %v3162_v37  ;;  %v3197_v37 = vpack.c.bf16 %v2239_v33, %v2238_v32  ;;  %v2505_v32 = vld [vmem:[%s4808_s13 + $0x30] sm:$0xff]  ;;  %v2506_v33 = vld [vmem:[%s4808_s13 + $0x38] sm:$0xff] }
 0x4ff   :  { %2808 = vmatmul.mubr.msk.f32.gmra.mrb[24].mxu1 %vm1966_vm13, %v1965_v14  ;;  %v3170_v14 = vpack.c.bf16 %v2225_v58, %v2224_v43  ;;  %v3206_v43 = vpack.c.bf16 %v2245_v57, %v2244_v56  ;;  %v2246_v58 = vld [vmem:[%s4804_s9 + $0x160] sm:$0xff] }
 0x500   :  { %3165 = vmatpush3.bf16.msra.mxu1 %v3164_v0  ;;  %v2243_v0 = vld [vmem:[%s4804_s9 + $0x148] sm:$0xff] }
 0x501   :  { %3167 = vmatprep.subr.bf16.mxu1 %v3166_v55  ;;  %v3203_v55 = vpack.c.bf16 %v2243_v0, %v2242_v63  ;;  %v2509_v63 = vld [vmem:[%s4808_s13 + $0x50] sm:$0xf] }
 0x504   :  { %3169 = vmatpush3.bf16.msra.mxu1 %v3168_v10  ;;  %v2247_v10 = vld [vmem:[%s4804_s9 + $0x168] sm:$0xff] }
 0x505   :  { %3171 = vmatprep.subr.bf16.mxu1 %v3170_v14  ;;  %v3209_v14 = vpack.c.bf16 %v2247_v10, %v2246_v58 }
 0x508   :  { %3173 = vmatpush3.bf16.msra.mxu1 %v3172_v9  ;;  %v2251_v9 = vld [vmem:[%s4804_s9 + $0x188] sm:$0xff] }
 0x509   :  { %3175 = vmatprep.subr.bf16.mxu1 %v3174_v11  ;;  %v3215_v11 = vpack.c.bf16 %v2251_v9, %v2250_v8 }
 0x50c   :  { %3177 = vmatpush3.bf16.msra.mxu1 %v3176_v21  ;;  %v3218_v21 = vpack.c.bf16 %v2403_v20, %v2402_v3 }
 0x50d   :  { %3179 = vmatprep.subr.bf16.mxu1 %v3178_v22  ;;  %v2405_v22 = vld [vmem:[%s4806_s11 + $0x18] sm:$0xff] }
 0x50e   :  { %v3221_v23 = vpack.c.bf16 %v2405_v22, %v2404_v38 }
 0x510   :  { %3181 = vmatpush3.bf16.msra.mxu1 %v3180_v26  ;;  %v2408_v26 = vld [vmem:[%s4806_s11 + $0x30] sm:$0xff] }
 0x511   :  { %3183 = vmatprep.subr.bf16.mxu1 %v3182_v27  ;;  %v2409_v27 = vld [vmem:[%s4806_s11 + $0x38] sm:$0xff] }
 0x512   :  { %v3227_v28 = vpack.c.bf16 %v2409_v27, %v2408_v26 }
 0x514   :  { %3185 = vmatpush3.bf16.msra.mxu1 %v3184_v30  ;;  %v2411_v30 = vld [vmem:[%s4806_s11 + $0x48] sm:$0xff] }
 0x515   :  { %3187 = vmatprep.subr.bf16.mxu1 %v3186_v29  ;;  %v3230_v31 = vpack.c.bf16 %v2411_v30, %v2410_v40  ;;  %v2413_v29 = vld [vmem:[%s4806_s11 + $0x58] sm:$0xff] }
 0x516   :  { %v3233_v36 = vpack.c.bf16 %v2413_v29, %v2412_v35 }
 0x518   :  { %3189 = vmatpush3.bf16.msra.mxu1 %v3188_v18  ;;  %v2415_v18 = vld [vmem:[%s4806_s11 + $0x68] sm:$0xff] }
 0x519   :  { %3190 = vmatprep.subr.bf16.mxu1 %v3377_v52 }
 0x5ce   :  { %v2045_v44 = vpop.f32.mrb[22].mxu1 }
 0x5cf   :  { %v2047_v45 = vpop.f32.mrb[23].mxu1  ;;  %2060 = vrot.lane.b32.xlu0 %v2045_v44, %s3379_s29 }
 0x5d0   :  { %2062 = vrot.lane.b32.xlu1 %v2047_v45, %s3379_s29 }
 0x5d2   :  { %v2051_v47 = vpop.f32.mrb[24].mxu1 }
 0x5d3   :  { %v2053_v48 = vpop.f32.mrb[25].mxu1  ;;  %2064 = vrot.lane.b32.xlu0 %v2051_v47, %s3379_s29 }
 0x5d4   :  { %2066 = vrot.lane.b32.xlu1 %v2053_v48, %s3379_s29 }
 0x641   :  { %v2061_v41 = vpop.permute.xlu0 %2060 }
 0x642   :  { %v2063_v49 = vpop.permute.xlu1 %2062 }
 0x643   :  { %v2069_v50 = vsel %vm2068_vm14, %v2061_v41, %v2063_v49  ;;  %v2076_v2 = vmax.f32 %v2047_v45, %v2063_v49 }
 0x644   :  { %v2075_v51 = vmax.f32 %v2045_v44, %v2069_v50 }
 0x645   :  { %2809 = vmatprep.mubr.msk.f32.mxu0 %vm2097_vm15, %v2076_v2  ;;  %v2065_v54 = vpop.permute.xlu0 %2064 }
 0x646   :  { %2169 = vmatmul.mubr.f32.vlgmr.msra.gmra.mrb[16].mxu0 %v2075_v51  ;;  %v2067_v60 = vpop.permute.xlu1 %2066 }
 0x647   :  { %v2070_v61 = vsel %vm2068_vm14, %v2065_v54, %v2067_v60  ;;  %v2078_v12 = vmax.f32 %v2053_v48, %v2067_v60  ;;  %v2234_v54 = vld [vmem:[%s4804_s9 + $0x100] sm:$0xff]  ;;  %v2235_v60 = vld [vmem:[%s4804_s9 + $0x108] sm:$0xff]  ;;  %3219 = vmatpush3.bf16.msra.mxu0 %v3218_v21  ;;  %s3384_s9 = smov [#allocation2]  }
 0x648   :  { %v2077_v1 = vmax.f32 %v2051_v47, %v2070_v61  ;;  %3220 = vmatprep.subr.bf16.mxu0 %v3377_v52  ;;  %s2601_s23 = sshll.u32 %s3384_s9, 4  ;;  %s2602_s23 = int_to_ptr.vmem [resolvable:$true] %s2601_s23 }
 0x649   :  { %2810 = vmatprep.mubr.msk.f32.mxu0 %vm2097_vm15, %v2078_v12  ;;  %p3356_p1 = scmp.lt.s32.totalorder %s2602_s23, %s2602_s23 }
 0x64a   :  { %2174 = vmatmul.mubr.f32.gmra.mrb[18].mxu0 %v2077_v1  ;;  %v3191_v1 = vpack.c.bf16 %v2235_v60, %v2234_v54 }
 0x64b   :  { %3222 = vmatpush3.bf16.msra.mxu0 %v3221_v23 }
 0x64c   :  { %3223 = vmatprep.subr.bf16.mxu0 %v3377_v52 }
 0x64f   :  { %3225 = vmatpush3.bf16.msra.mxu0 %v3224_v25 }
 0x650   :  { %3226 = vmatprep.subr.bf16.mxu0 %v3377_v52 }
 0x653   :  { %3228 = vmatpush3.bf16.msra.mxu0 %v3227_v28 }
 0x654   :  { %3229 = vmatprep.subr.bf16.mxu0 %v3377_v52 }
 0x657   :  { %3231 = vmatpush3.bf16.msra.mxu0 %v3230_v31 }
 0x658   :  { %3232 = vmatprep.subr.bf16.mxu0 %v3377_v52 }
 0x65b   :  { %3234 = vmatpush3.bf16.msra.mxu0 %v3233_v36 }
 0x65c   :  { %3235 = vmatprep.subr.bf16.mxu0 %v3377_v52 }
 0x719   :  { %v2170_v44 = vpop.f32.mrb[16].mxu0 }
 0x71a   :  { %v2172_v45 = vpop.f32.mrb[17].mxu0  ;;  %v2180_v47 = vrot.slane %v2170_v44, 2  ;;  %v2184_v48 = vrot.slane %v2170_v44, 4  ;;  %v2188_v50 = vrot.slane %v2170_v44, 6 }
 0x71b   :  { %v2416_v45 = vld [vmem:[%s4806_s11 + $0x70] sm:$0xff] }
 0x71c   :  { %2181 = vrot.lane.b32.xlu0 %v2180_v47, %s3380_s7  ;;  %2185 = vrot.lane.b32.xlu1 %v2184_v48, %s3381_s25 }
 0x71d   :  { %v2175_v41 = vpop.f32.mrb[18].mxu0 }
 0x71e   :  { %v2177_v49 = vpop.f32.mrb[19].mxu0 }
 0x71f   :  { %v2811_v49 = vld [vmem:[%s4805_s10] ss:$0 sm:$0xff] }
 0x720   :  { %2189 = vrot.lane.b32.xlu0 %v2188_v50, %s3379_s29  ;;  %2193 = vrot.lane.b32.xlu1 %v2175_v41, %s3382_s26 }
 0x78e   :  { %v2182_v2 = vpop.permute.xlu0 %2181  ;;  %v2186_v51 = vpop.permute.xlu1 %2185 }
 0x78f   :  { %v2198_v61 = vsel %vm100_vm2, %v2182_v2, %v2186_v51  ;;  %v2197_v13 = vsel %vm2196_vm0, %v2170_v44, %v2182_v2  ;;  %v3236_v44 = vpack.c.bf16 %v2415_v18, %v2414_v42  ;;  %vm3383_vm2 = vmmov 0   ;;  %v2499_v2 = vld [vmem:[%s4808_s13] sm:$0xff]  ;;  %v2500_v51 = vld [vmem:[%s4808_s13 + $0x8] sm:$0xff] }
 0x790   :  { %2911 = vmatprep.mubr.msk.f32.mxu0 %vm3383_vm2, %v3375_v7 }
 0x791   :  { %3237 = vmatpush3.bf16.msra.mxu0 %v3236_v44 }
 0x792   :  { %v2190_v12 = vpop.permute.xlu0 %2189  ;;  %v2194_v19 = vpop.permute.xlu1 %2193  ;;  %2909 = vmatprep.subr.mxu0 %v3375_v7 }
 0x793   :  { %v2199_v16 = vsel %vm2068_vm14, %v2198_v61, %v2190_v12  ;;  %v2201_v15 = vsel %vm2200_vm1, %v2190_v12, %v2194_v19  ;;  %v3239_v12 = vpack.c.bf16 %v2500_v51, %v2499_v2 }
 0x794   :  { %2325 = vmatprep.mubr.f32.mxu1 %v2199_v16  ;;  %v2501_v16 = vld [vmem:[%s4808_s13 + $0x10] sm:$0xff] }
 0x795   :  { %2326 = vmatmul.mubr.f32.vlgmr.msra.gmra.mrb[26].mxu1 %v2197_v13  ;;  %2910 = vmatpush3.msra.mxu0 %v2416_v45  ;;  %v3242_v5 = vpack.c.bf16 %v2502_v59, %v2501_v16  ;;  %v2503_v13 = vld [vmem:[%s4808_s13 + $0x20] sm:$0xff] }
 0x796   :  { %3192 = vmatpush1.bf16.msra.mxu1 %v3191_v1  ;;  %2812 = vmatprep.mubr.msk.f32.mxu1 %vm2097_vm15, %v2194_v19  ;;  %v2504_v19 = vld [vmem:[%s4808_s13 + $0x28] sm:$0xff]  ;;  %s3351_s13 = scalar_lea.vmem %s2602_s23, 32 }
 0x797   :  { %3193 = vmatprep.subr.bf16.mxu1 %v3377_v52  ;;  %3238 = vmatprep.subr.bf16.mxu0 %v3377_v52  ;;  %p3352_p0 = scmp.ne.s32.totalorder %s2602_s23, %s3351_s13  ;;  %p3357_p2 = scmp.lt.s32.totalorder %s3351_s13, %s3351_s13 }
 0x799   :  { %p3358_p3 = por %p3357_p2, %p3356_p1 }
 0x79a   :  { %3195 = vmatpush1.bf16.msra.mxu1 %v3194_v46  ;;  %v3245_v46 = vpack.c.bf16 %v2504_v19, %v2503_v13 }
 0x79b   :  { %3196 = vmatprep.subr.bf16.mxu1 %v3377_v52  ;;  %p3359_p4 = pnand %p3358_p3, %p3352_p0 }
 0x79e   :  { %3198 = vmatpush1.bf16.msra.mxu1 %v3197_v37  ;;  %v3248_v37 = vpack.c.bf16 %v2506_v33, %v2505_v32 }
 0x79f   :  { %3199 = vmatprep.subr.bf16.mxu1 %v3377_v52 }
 0x7a2   :  { %3201 = vmatpush1.bf16.msra.mxu1 %v3200_v62  ;;  %v3251_v62 = vpack.c.bf16 %v2508_v39, %v2507_v34 }
 0x7a3   :  { %3202 = vmatprep.subr.bf16.mxu1 %v3377_v52 }
 0x7a6   :  { %3204 = vmatpush1.bf16.msra.mxu1 %v3203_v55 }
 0x7a7   :  { %3205 = vmatprep.subr.bf16.mxu1 %v3377_v52 }
 0x7aa   :  { %3207 = vmatpush1.bf16.msra.mxu1 %v3206_v43 }
 0x7ab   :  { %3208 = vmatprep.subr.bf16.mxu1 %v3377_v52 }
 0x7ae   :  { %3210 = vmatpush1.bf16.msra.mxu1 %v3209_v14 }
 0x7af   :  { %3211 = vmatprep.subr.bf16.mxu1 %v3377_v52 }
 0x7b2   :  { %3213 = vmatpush1.bf16.msra.mxu1 %v3212_v6 }
 0x7b3   :  { %3214 = vmatprep.subr.bf16.mxu1 %v3377_v52 }
 0x7b6   :  { %3216 = vmatpush1.bf16.msra.mxu1 %v3215_v11 }
 0x7b9   :  { %2396 = vmatmul.mubr.f32.vlgmr.msra.gmra.mrb[28].mxu1 %v2201_v15 }
 0x868   :  { %v2850_v47 = vpop.f32.mrb[26].mxu1 }
 0x869   :  { %v2851_v48 = vpop.f32.mrb[27].mxu1 }
 0x86a   :  { %v2852_v41 = vadd.f32 %v2851_v48, %v2850_v47 }
 0x86c   :  { %v2328_v50 = vadd.f32 %v2852_v41, %v2811_v49 }
 0x88c   :  { %v2397_v54 = vpop.f32.mrb[28].mxu1 }
 0x88d   :  { %v2398_v60 = vadd.f32 %v2397_v54, %v2328_v50  ;;  %v2399_v61 = vpop.f32.mrb[29].mxu1 }
 0x88f   :  { %v2401_v1 = vmax.f32 %v2398_v60, 0.0 }
 0x891   :  { %2912 = vmatmul.mubr.msk.f32.vlgmr.msra.gmra.mrb[20].mxu0 %vm2424_vm3, %v2401_v1 }
 0x892   :  { %3240 = vmatpush3.bf16.msra.mxu0 %v3239_v12  ;;  %2936 = vmatprep.mubr.msk.f32.mxu0 %vm3383_vm2, %v3375_v7 }
 0x893   :  { %3241 = vmatprep.subr.bf16.mxu0 %v3377_v52 }
 0x896   :  { %3243 = vmatpush3.bf16.msra.mxu0 %v3242_v5 }
 0x897   :  { %3244 = vmatprep.subr.bf16.mxu0 %v3377_v52 }
 0x89a   :  { %3246 = vmatpush3.bf16.msra.mxu0 %v3245_v46 }
 0x89b   :  { %3247 = vmatprep.subr.bf16.mxu0 %v3377_v52 }
 0x89e   :  { %3249 = vmatpush3.bf16.msra.mxu0 %v3248_v37 }
 0x89f   :  { %3250 = vmatprep.subr.bf16.mxu0 %v3377_v52  ;;  %v2813_v52 = vld [vmem:[%s4807_s12] ss:$0 sm:$0xff] }
 0x8a2   :  { %3252 = vmatpush3.bf16.msra.mxu0 %v3251_v62 }
 0x8a3   :  { %2934 = vmatprep.subr.mxu0 %v3375_v7  ;;  %v2815_v7 = vld [vmem:[%s4809_s14] ss:$0 sm:$0xff] }
 0x8a6   :  { %2935 = vmatpush3.msk.msra.mxu0 %vm708_vm4, %v2509_v63 }
 0x964   :  { %v2494_v0 = vpop.f32.mrb[20].mxu0 }
 0x965   :  { %v2495_v55 = vadd.f32 %v2813_v52, %v2494_v0  ;;  %v2913_v56 = vpop.f32.mrb[21].mxu0 }
 0x967   :  { %v2498_v57 = vmax.f32 %v2495_v55, 0.0 }
 0x969   :  { %2937 = vmatmul.mubr.msk.f32.vlgmr.msra.gmra.mrb[22].mxu0 %vm1328_vm12, %v2498_v57 }
 0xa3c   :  { %v2589_v43 = vpop.f32.mrb[22].mxu0 }
 0xa3d   :  { %v2590_v58 = vadd.f32 %v2815_v7, %v2589_v43  ;;  %v2938_v10 = vpop.f32.mrb[23].mxu0 }
 0xa3f   :  { %2594 = vst.msk [vmem:[#allocation2] sm:$0x3] %vm2593_vm5, %v2590_v58 }
 0xa40   :  { %3362 = shalt.err (!%p3359_p4)
}
 0xa41   :  { %s3363_s11 = scalar_lea.hbm %s4810_s15, 32 }
 0xa42   :  { %p3364_p5 = scmp.ne.s32.totalorder %s4810_s15, %s3363_s11  ;;  %p3367_p6 = scmp.lt.u32.totalorder %s3363_s11, %s4810_s15 }
 0xa44   :  { %p3369_p7 = pnand %p3367_p6, %p3364_p5 }
 0xa46   :  { %3372 = shalt.err (!%p3369_p7)
}
 0xa47   :  { %2604 = dma.vmem_to_hbm [thread:$0]  %s2602_s23, 32, %s4810_s15, [#allocation3]  }
 0xa48   :  { %3373 = dma.done.wait [#allocation3], 32  }
 0xa49   :  { %3374 = vsyncadd [#allocation3], 4294967264 }
 0xa4a   :  { %2608 = vsyncpa [#allocation3], 1 }

</bundles_post_ra>
